<compile_context>
chip_gen: v7x
topology: tpu7x:2x2x1
jax: 0.10.0
libtpu: 0.0.40
codegen_flags: <defaults>
</compile_context>

<pallas_src>
import math
import functools

import jax
import jax.numpy as jnp
from jax.experimental import pallas as pl
from jax.experimental.pallas import tpu as pltpu


def _layernorm(x, gamma, beta, eps=1e-8):
    # torch.nn.LayerNorm(eps=1e-08): biased variance over last dim, f32 math.
    mean = jnp.mean(x, axis=-1, keepdims=True)
    var = jnp.mean(jnp.square(x - mean), axis=-1, keepdims=True)
    return (x - mean) * jax.lax.rsqrt(var + eps) * gamma + beta


def _gelu_tanh(x):
    # tanh-approximate GELU (f32)
    c = math.sqrt(2.0 / math.pi)
    return 0.5 * x * (1.0 + jnp.tanh(c * (x + 0.044715 * x * x * x)))


def block_kernel(num_heads, seq_len,
                 x_ref,
                 g1_ref, be1_ref,
                 wq_ref, bq_ref, wk_ref, bk_ref, wv_ref, bv_ref,
                 wo_ref, bo_ref,
                 g2_ref, be2_ref,
                 w1_ref, b1_ref, w2_ref, b2_ref,
                 out_ref, attn_ref):
    R, D = x_ref.shape                      # R = Bt * S rows (flattened slab)
    H = num_heads
    S = seq_len
    Bt = R // S
    hd = D // H
    scale = 1.0 / math.sqrt(hd)

    g1, be1 = g1_ref[0], be1_ref[0]         # (D,) f32
    g2, be2 = g2_ref[0], be2_ref[0]

    x = x_ref[...]                          # (R, D) f32 — no in-kernel concat

    # ---- attention branch --------------------------------------------------
    residual = x
    xn = _layernorm(x, g1, be1)             # f32
    xn_b = xn.astype(jnp.bfloat16)          # bf16 only at the MXU boundary

    q = jnp.dot(xn_b, wq_ref[...], preferred_element_type=jnp.float32) + bq_ref[0]
    k = jnp.dot(xn_b, wk_ref[...], preferred_element_type=jnp.float32) + bk_ref[0]
    v = jnp.dot(xn_b, wv_ref[...], preferred_element_type=jnp.float32) + bv_ref[0]

    q = q * scale                           # fold 1/sqrt(hd) into q (O(R*D))

    qb = q.astype(jnp.bfloat16)
    kb = k.astype(jnp.bfloat16)
    vb = v.astype(jnp.bfloat16)

    def to_heads(z):                        # (R, D) -> (Bt*H, S, hd), head-major
        return jnp.stack(
            [z[b * S:(b + 1) * S, h * hd:(h + 1) * hd]
             for b in range(Bt) for h in range(H)], axis=0)

    qh, kh, vh = to_heads(qb), to_heads(kb), to_heads(vb)

    # one batched contraction over all (batch, head) pairs
    s = jnp.einsum('bqd,bkd->bqk', qh, kh,
                   preferred_element_type=jnp.float32)       # (Bt*H, S, S) f32
    s = s - jnp.max(s, axis=-1, keepdims=True)
    e = jnp.exp(s)
    p = e / jnp.sum(e, axis=-1, keepdims=True)               # exact softmax
    attn_ref[...] = p.reshape(Bt, H, S, S)                   # free leading split

    ctx = jnp.einsum('bqk,bkd->bqd', p.astype(jnp.bfloat16), vh,
                     preferred_element_type=jnp.float32)     # (Bt*H, S, hd) f32

    # merge heads back to the (R, D) row slab
    rows = [jnp.concatenate([ctx[b * H + h] for h in range(H)], axis=-1)
            for b in range(Bt)]
    ctx_all = jnp.concatenate(rows, axis=0)                  # (R, D) f32

    attn_out = jnp.dot(ctx_all.astype(jnp.bfloat16), wo_ref[...],
                       preferred_element_type=jnp.float32) + bo_ref[0]
    x1 = attn_out + residual

    # ---- MLP branch ---------------------------------------------------------
    residual2 = x1
    xn2 = _layernorm(x1, g2, be2)
    h1 = jnp.dot(xn2.astype(jnp.bfloat16), w1_ref[...],
                 preferred_element_type=jnp.float32) + b1_ref[0]
    h1 = _gelu_tanh(h1)
    mlp_out = jnp.dot(h1.astype(jnp.bfloat16), w2_ref[...],
                      preferred_element_type=jnp.float32) + b2_ref[0]

    out_ref[...] = mlp_out + residual2                       # one slab store


def _pick_block_batch(B, S, target_rows=512):
    """Largest divisor Bt of B with Bt*S <= target_rows, capped at B//2 so the
    grid has >= 2 parallel steps (keeps both v7x TensorCores busy)."""
    bt = max(1, min(B, target_rows // max(S, 1)))
    if B >= 2:
        bt = min(bt, B // 2)
    while bt > 1 and B % bt != 0:
        bt -= 1
    return max(bt, 1)


def block_forward(x, params, num_heads):
    """x: (B, S, D) float32. Returns (out (B,S,D), attn_weights (B,H,S,S))."""
    B, S, D = x.shape
    M = params["w1"].shape[1]
    H = num_heads
    assert D % H == 0, "dim_of_model must be divisible by num_of_heads"

    Bt = _pick_block_batch(B, S)
    Rt = Bt * S
    grid = (B // Bt,)

    x_rows = x.reshape(B * S, D)            # flatten rows in the wrapper (free)

    def fixed(shape):
        nd = len(shape)
        return pl.BlockSpec(shape, lambda i, _nd=nd: (0,) * _nd)

    in_specs = [
        pl.BlockSpec((Rt, D), lambda i: (i, 0)),        # x (row slab)
        fixed((1, D)), fixed((1, D)),                   # ln1 gamma/beta
        fixed((D, D)), fixed((1, D)),                   # Wq, bq
        fixed((D, D)), fixed((1, D)),                   # Wk, bk
        fixed((D, D)), fixed((1, D)),                   # Wv, bv
        fixed((D, D)), fixed((1, D)),                   # Wo, bo
        fixed((1, D)), fixed((1, D)),                   # ln2 gamma/beta
        fixed((D, M)), fixed((1, M)),                   # W1, b1
        fixed((M, D)), fixed((1, D)),                   # W2, b2
    ]
    out_specs = [
        pl.BlockSpec((Rt, D), lambda i: (i, 0)),
        pl.BlockSpec((Bt, H, S, S), lambda i: (i, 0, 0, 0)),
    ]
    out_shape = [
        jax.ShapeDtypeStruct((B * S, D), jnp.float32),
        jax.ShapeDtypeStruct((B, H, S, S), jnp.float32),
    ]

    kernel = functools.partial(block_kernel, num_heads, S)
    out_rows, attn_w = pl.pallas_call(
        kernel,
        out_shape=out_shape,
        grid_spec=pltpu.PrefetchScalarGridSpec(
            num_scalar_prefetch=0,
            grid=grid,
            in_specs=in_specs,
            out_specs=out_specs,
        ),
        compiler_params=pltpu.CompilerParams(
            dimension_semantics=("parallel",),
            vmem_limit_bytes=64 * 1024 * 1024,
        ),
    )(
        x_rows,
        params["g1"], params["be1"],
        params["wq"], params["bq"],
        params["wk"], params["bk"],
        params["wv"], params["bv"],
        params["wo"], params["bo"],
        params["g2"], params["be2"],
        params["w1"], params["b1"],
        params["w2"], params["b2"],
    )
    return out_rows.reshape(B, S, D), attn_w


def init_params(key, dim, mlp_dim):
    ks = jax.random.split(key, 8)
    s_d = 1.0 / math.sqrt(dim)
    s_m = 1.0 / math.sqrt(mlp_dim)
    f32, bf16 = jnp.float32, jnp.bfloat16
    return {
        # LayerNorm 1 / 2 (torch init: gamma=1, beta=0) — keep f32
        "g1": jnp.ones((1, dim), f32), "be1": jnp.zeros((1, dim), f32),
        "g2": jnp.ones((1, dim), f32), "be2": jnp.zeros((1, dim), f32),
        # attention projections, stored (in, out), bf16 for the MXU
        "wq": (jax.random.normal(ks[0], (dim, dim), f32) * s_d).astype(bf16),
        "bq": jnp.zeros((1, dim), f32),
        "wk": (jax.random.normal(ks[1], (dim, dim), f32) * s_d).astype(bf16),
        "bk": jnp.zeros((1, dim), f32),
        "wv": (jax.random.normal(ks[2], (dim, dim), f32) * s_d).astype(bf16),
        "bv": jnp.zeros((1, dim), f32),
        "wo": (jax.random.normal(ks[3], (dim, dim), f32) * s_d).astype(bf16),
        "bo": jnp.zeros((1, dim), f32),
        # MLP
        "w1": (jax.random.normal(ks[4], (dim, mlp_dim), f32) * s_d).astype(bf16),
        "b1": jnp.zeros((1, mlp_dim), f32),
        "w2": (jax.random.normal(ks[5], (mlp_dim, dim), f32) * s_m).astype(bf16),
        "b2": jnp.zeros((1, dim), f32),
    }


if __name__ == "__main__":
    # small shapes consistent with the module
    B, S, D, H, M = 2, 8, 32, 4, 64   # batch, seq, d_model, heads, d_mlp

    key = jax.random.PRNGKey(0)
    kx, kp = jax.random.split(key)
    x = jax.random.normal(kx, (B, S, D), jnp.float32)
    params = init_params(kp, D, M)

    out, attn_w = block_forward(x, params, num_heads=H)
    jax.block_until_ready(out)
    jax.block_until_ready(attn_w)

    assert out.shape == (B, S, D)
    assert attn_w.shape == (B, H, S, S)
    assert bool(jnp.all(jnp.isfinite(out)))
    assert bool(jnp.all(jnp.isfinite(attn_w)))
    # attention rows must sum to ~1 (exact softmax reciprocal)
    assert bool(jnp.all(jnp.abs(jnp.sum(attn_w, axis=-1) - 1.0) < 1e-4))
    print("KERNEL_OK")
</pallas_src>

<mosaic_0001>
module attributes {stable_mosaic.version = 11 : i64} {
  func.func @block_kernel(%arg0: i32, %arg1: memref<8x32xf32, #tpu.memory_space<vmem>>, %arg2: memref<1x32xf32, #tpu.memory_space<vmem>>, %arg3: memref<1x32xf32, #tpu.memory_space<vmem>>, %arg4: memref<32x32xbf16, #tpu.memory_space<vmem>>, %arg5: memref<1x32xf32, #tpu.memory_space<vmem>>, %arg6: memref<32x32xbf16, #tpu.memory_space<vmem>>, %arg7: memref<1x32xf32, #tpu.memory_space<vmem>>, %arg8: memref<32x32xbf16, #tpu.memory_space<vmem>>, %arg9: memref<1x32xf32, #tpu.memory_space<vmem>>, %arg10: memref<32x32xbf16, #tpu.memory_space<vmem>>, %arg11: memref<1x32xf32, #tpu.memory_space<vmem>>, %arg12: memref<1x32xf32, #tpu.memory_space<vmem>>, %arg13: memref<1x32xf32, #tpu.memory_space<vmem>>, %arg14: memref<32x64xbf16, #tpu.memory_space<vmem>>, %arg15: memref<1x64xf32, #tpu.memory_space<vmem>>, %arg16: memref<64x32xbf16, #tpu.memory_space<vmem>>, %arg17: memref<1x32xf32, #tpu.memory_space<vmem>>, %arg18: memref<8x32xf32, #tpu.memory_space<vmem>>, %arg19: memref<1x4x8x8xf32, #tpu.memory_space<vmem>>) attributes {dimension_semantics = [#tpu.dimension_semantics<parallel>], iteration_bounds = array<i64: 2>, scalar_prefetch = 0 : i64, scratch_operands = 0 : i64, tpu.core_type = #tpu.core_type<tc>, window_params = [{transform_indices = @transform_0, window_bounds = array<i64: 8, 32>}, {pipeline_mode = #tpu.pipeline_mode<synchronous>, transform_indices = @transform_1, window_bounds = array<i64: 1, 32>}, {pipeline_mode = #tpu.pipeline_mode<synchronous>, transform_indices = @transform_2, window_bounds = array<i64: 1, 32>}, {pipeline_mode = #tpu.pipeline_mode<synchronous>, transform_indices = @transform_3, window_bounds = array<i64: 32, 32>}, {pipeline_mode = #tpu.pipeline_mode<synchronous>, transform_indices = @transform_4, window_bounds = array<i64: 1, 32>}, {pipeline_mode = #tpu.pipeline_mode<synchronous>, transform_indices = @transform_5, window_bounds = array<i64: 32, 32>}, {pipeline_mode = #tpu.pipeline_mode<synchronous>, transform_indices = @transform_6, window_bounds = array<i64: 1, 32>}, {pipeline_mode = #tpu.pipeline_mode<synchronous>, transform_indices = @transform_7, window_bounds = array<i64: 32, 32>}, {pipeline_mode = #tpu.pipeline_mode<synchronous>, transform_indices = @transform_8, window_bounds = array<i64: 1, 32>}, {pipeline_mode = #tpu.pipeline_mode<synchronous>, transform_indices = @transform_9, window_bounds = array<i64: 32, 32>}, {pipeline_mode = #tpu.pipeline_mode<synchronous>, transform_indices = @transform_10, window_bounds = array<i64: 1, 32>}, {pipeline_mode = #tpu.pipeline_mode<synchronous>, transform_indices = @transform_11, window_bounds = array<i64: 1, 32>}, {pipeline_mode = #tpu.pipeline_mode<synchronous>, transform_indices = @transform_12, window_bounds = array<i64: 1, 32>}, {pipeline_mode = #tpu.pipeline_mode<synchronous>, transform_indices = @transform_13, window_bounds = array<i64: 32, 64>}, {pipeline_mode = #tpu.pipeline_mode<synchronous>, transform_indices = @transform_14, window_bounds = array<i64: 1, 64>}, {pipeline_mode = #tpu.pipeline_mode<synchronous>, transform_indices = @transform_15, window_bounds = array<i64: 64, 32>}, {pipeline_mode = #tpu.pipeline_mode<synchronous>, transform_indices = @transform_16, window_bounds = array<i64: 1, 32>}, {transform_indices = @transform_17, window_bounds = array<i64: 8, 32>}, {transform_indices = @transform_18, window_bounds = array<i64: 1, 4, 8, 8>}]} {
    %c0 = arith.constant 0 : index
    %c0_0 = arith.constant 0 : index
    %0 = vector.load %arg2[%c0, %c0_0] : memref<1x32xf32, #tpu.memory_space<vmem>>, vector<1x32xf32>
    %1 = vector.shape_cast %0 : vector<1x32xf32> to vector<32xf32>
    %c0_1 = arith.constant 0 : index
    %c0_2 = arith.constant 0 : index
    %2 = vector.load %arg3[%c0_1, %c0_2] : memref<1x32xf32, #tpu.memory_space<vmem>>, vector<1x32xf32>
    %3 = vector.shape_cast %2 : vector<1x32xf32> to vector<32xf32>
    %c0_3 = arith.constant 0 : index
    %c0_4 = arith.constant 0 : index
    %4 = vector.load %arg12[%c0_3, %c0_4] : memref<1x32xf32, #tpu.memory_space<vmem>>, vector<1x32xf32>
    %5 = vector.shape_cast %4 : vector<1x32xf32> to vector<32xf32>
    %c0_5 = arith.constant 0 : index
    %c0_6 = arith.constant 0 : index
    %6 = vector.load %arg13[%c0_5, %c0_6] : memref<1x32xf32, #tpu.memory_space<vmem>>, vector<1x32xf32>
    %7 = vector.shape_cast %6 : vector<1x32xf32> to vector<32xf32>
    %c0_7 = arith.constant 0 : index
    %c0_8 = arith.constant 0 : index
    %8 = vector.load %arg1[%c0_7, %c0_8] : memref<8x32xf32, #tpu.memory_space<vmem>>, vector<8x32xf32>
    %cst = arith.constant dense<0.000000e+00> : vector<8xf32>
    %9 = vector.multi_reduction <add>, %8, %cst [1] : vector<8x32xf32> to vector<8xf32>
    %10 = vector.shape_cast %9 : vector<8xf32> to vector<8x1xf32>
    %cst_9 = arith.constant 3.200000e+01 : f32
    %11 = vector.broadcast %cst_9 : f32 to vector<8x1xf32>
    %12 = arith.divf %10, %11 : vector<8x1xf32>
    %13 = vector.broadcast %12 : vector<8x1xf32> to vector<8x32xf32>
    %14 = arith.subf %8, %13 : vector<8x32xf32>
    %15 = arith.mulf %14, %14 : vector<8x32xf32>
    %cst_10 = arith.constant dense<0.000000e+00> : vector<8xf32>
    %16 = vector.multi_reduction <add>, %15, %cst_10 [1] : vector<8x32xf32> to vector<8xf32>
    %17 = vector.shape_cast %16 : vector<8xf32> to vector<8x1xf32>
    %cst_11 = arith.constant 3.200000e+01 : f32
    %18 = vector.broadcast %cst_11 : f32 to vector<8x1xf32>
    %19 = arith.divf %17, %18 : vector<8x1xf32>
    %20 = vector.broadcast %12 : vector<8x1xf32> to vector<8x32xf32>
    %21 = arith.subf %8, %20 : vector<8x32xf32>
    %cst_12 = arith.constant 9.99999993E-9 : f32
    %22 = vector.broadcast %cst_12 : f32 to vector<8x1xf32>
    %23 = arith.addf %19, %22 : vector<8x1xf32>
    %24 = math.rsqrt %23 : vector<8x1xf32>
    %25 = vector.broadcast %24 : vector<8x1xf32> to vector<8x32xf32>
    %26 = arith.mulf %21, %25 : vector<8x32xf32>
    %27 = vector.shape_cast %1 : vector<32xf32> to vector<1x32xf32>
    %28 = vector.broadcast %27 : vector<1x32xf32> to vector<8x32xf32>
    %29 = arith.mulf %26, %28 : vector<8x32xf32>
    %30 = vector.shape_cast %3 : vector<32xf32> to vector<1x32xf32>
    %31 = vector.broadcast %30 : vector<1x32xf32> to vector<8x32xf32>
    %32 = arith.addf %29, %31 : vector<8x32xf32>
    %33 = arith.truncf %32 : vector<8x32xf32> to vector<8x32xbf16>
    %c0_13 = arith.constant 0 : index
    %c0_14 = arith.constant 0 : index
    %34 = vector.load %arg4[%c0_13, %c0_14] : memref<32x32xbf16, #tpu.memory_space<vmem>>, vector<32x32xbf16>
    %cst_15 = arith.constant dense<0.000000e+00> : vector<8x32xf32>
    %35 = tpu.matmul %33, %34, %cst_15 {dimension_numbers = #tpu.dot_dimension_numbers<[1], [0], [0], [1], [0, 0, 1, 1], [], []>} : vector<8x32xbf16>, vector<32x32xbf16>, vector<8x32xf32> -> vector<8x32xf32>
    %c0_16 = arith.constant 0 : index
    %c0_17 = arith.constant 0 : index
    %36 = vector.load %arg5[%c0_16, %c0_17] : memref<1x32xf32, #tpu.memory_space<vmem>>, vector<1x32xf32>
    %37 = vector.shape_cast %36 : vector<1x32xf32> to vector<32xf32>
    %38 = vector.shape_cast %37 : vector<32xf32> to vector<1x32xf32>
    %39 = vector.broadcast %38 : vector<1x32xf32> to vector<8x32xf32>
    %40 = arith.addf %35, %39 : vector<8x32xf32>
    %c0_18 = arith.constant 0 : index
    %c0_19 = arith.constant 0 : index
    %41 = vector.load %arg6[%c0_18, %c0_19] : memref<32x32xbf16, #tpu.memory_space<vmem>>, vector<32x32xbf16>
    %cst_20 = arith.constant dense<0.000000e+00> : vector<8x32xf32>
    %42 = tpu.matmul %33, %41, %cst_20 {dimension_numbers = #tpu.dot_dimension_numbers<[1], [0], [0], [1], [0, 0, 1, 1], [], []>} : vector<8x32xbf16>, vector<32x32xbf16>, vector<8x32xf32> -> vector<8x32xf32>
    %c0_21 = arith.constant 0 : index
    %c0_22 = arith.constant 0 : index
    %43 = vector.load %arg7[%c0_21, %c0_22] : memref<1x32xf32, #tpu.memory_space<vmem>>, vector<1x32xf32>
    %44 = vector.shape_cast %43 : vector<1x32xf32> to vector<32xf32>
    %45 = vector.shape_cast %44 : vector<32xf32> to vector<1x32xf32>
    %46 = vector.broadcast %45 : vector<1x32xf32> to vector<8x32xf32>
    %47 = arith.addf %42, %46 : vector<8x32xf32>
    %c0_23 = arith.constant 0 : index
    %c0_24 = arith.constant 0 : index
    %48 = vector.load %arg8[%c0_23, %c0_24] : memref<32x32xbf16, #tpu.memory_space<vmem>>, vector<32x32xbf16>
    %cst_25 = arith.constant dense<0.000000e+00> : vector<8x32xf32>
    %49 = tpu.matmul %33, %48, %cst_25 {dimension_numbers = #tpu.dot_dimension_numbers<[1], [0], [0], [1], [0, 0, 1, 1], [], []>} : vector<8x32xbf16>, vector<32x32xbf16>, vector<8x32xf32> -> vector<8x32xf32>
    %c0_26 = arith.constant 0 : index
    %c0_27 = arith.constant 0 : index
    %50 = vector.load %arg9[%c0_26, %c0_27] : memref<1x32xf32, #tpu.memory_space<vmem>>, vector<1x32xf32>
    %51 = vector.shape_cast %50 : vector<1x32xf32> to vector<32xf32>
    %52 = vector.shape_cast %51 : vector<32xf32> to vector<1x32xf32>
    %53 = vector.broadcast %52 : vector<1x32xf32> to vector<8x32xf32>
    %54 = arith.addf %49, %53 : vector<8x32xf32>
    %cst_28 = arith.constant 0.353553385 : f32
    %55 = vector.broadcast %cst_28 : f32 to vector<8x32xf32>
    %56 = arith.mulf %40, %55 : vector<8x32xf32>
    %57 = arith.truncf %56 : vector<8x32xf32> to vector<8x32xbf16>
    %58 = arith.truncf %47 : vector<8x32xf32> to vector<8x32xbf16>
    %59 = arith.truncf %54 : vector<8x32xf32> to vector<8x32xbf16>
    %60 = vector.extract_strided_slice %57 {offsets = [0, 0], sizes = [8, 8], strides = [1, 1]} : vector<8x32xbf16> to vector<8x8xbf16>
    %61 = vector.extract_strided_slice %57 {offsets = [0, 8], sizes = [8, 8], strides = [1, 1]} : vector<8x32xbf16> to vector<8x8xbf16>
    %62 = vector.extract_strided_slice %57 {offsets = [0, 16], sizes = [8, 8], strides = [1, 1]} : vector<8x32xbf16> to vector<8x8xbf16>
    %63 = vector.extract_strided_slice %57 {offsets = [0, 24], sizes = [8, 8], strides = [1, 1]} : vector<8x32xbf16> to vector<8x8xbf16>
    %64 = vector.shape_cast %60 : vector<8x8xbf16> to vector<1x8x8xbf16>
    %65 = vector.shape_cast %61 : vector<8x8xbf16> to vector<1x8x8xbf16>
    %66 = vector.shape_cast %62 : vector<8x8xbf16> to vector<1x8x8xbf16>
    %67 = vector.shape_cast %63 : vector<8x8xbf16> to vector<1x8x8xbf16>
    %68 = tpu.concatenate %64, %65, %66, %67 in 0 : vector<1x8x8xbf16>, vector<1x8x8xbf16>, vector<1x8x8xbf16>, vector<1x8x8xbf16> -> vector<4x8x8xbf16>
    %69 = vector.extract_strided_slice %58 {offsets = [0, 0], sizes = [8, 8], strides = [1, 1]} : vector<8x32xbf16> to vector<8x8xbf16>
    %70 = vector.extract_strided_slice %58 {offsets = [0, 8], sizes = [8, 8], strides = [1, 1]} : vector<8x32xbf16> to vector<8x8xbf16>
    %71 = vector.extract_strided_slice %58 {offsets = [0, 16], sizes = [8, 8], strides = [1, 1]} : vector<8x32xbf16> to vector<8x8xbf16>
    %72 = vector.extract_strided_slice %58 {offsets = [0, 24], sizes = [8, 8], strides = [1, 1]} : vector<8x32xbf16> to vector<8x8xbf16>
    %73 = vector.shape_cast %69 : vector<8x8xbf16> to vector<1x8x8xbf16>
    %74 = vector.shape_cast %70 : vector<8x8xbf16> to vector<1x8x8xbf16>
    %75 = vector.shape_cast %71 : vector<8x8xbf16> to vector<1x8x8xbf16>
    %76 = vector.shape_cast %72 : vector<8x8xbf16> to vector<1x8x8xbf16>
    %77 = tpu.concatenate %73, %74, %75, %76 in 0 : vector<1x8x8xbf16>, vector<1x8x8xbf16>, vector<1x8x8xbf16>, vector<1x8x8xbf16> -> vector<4x8x8xbf16>
    %78 = vector.extract_strided_slice %59 {offsets = [0, 0], sizes = [8, 8], strides = [1, 1]} : vector<8x32xbf16> to vector<8x8xbf16>
    %79 = vector.extract_strided_slice %59 {offsets = [0, 8], sizes = [8, 8], strides = [1, 1]} : vector<8x32xbf16> to vector<8x8xbf16>
    %80 = vector.extract_strided_slice %59 {offsets = [0, 16], sizes = [8, 8], strides = [1, 1]} : vector<8x32xbf16> to vector<8x8xbf16>
    %81 = vector.extract_strided_slice %59 {offsets = [0, 24], sizes = [8, 8], strides = [1, 1]} : vector<8x32xbf16> to vector<8x8xbf16>
    %82 = vector.shape_cast %78 : vector<8x8xbf16> to vector<1x8x8xbf16>
    %83 = vector.shape_cast %79 : vector<8x8xbf16> to vector<1x8x8xbf16>
    %84 = vector.shape_cast %80 : vector<8x8xbf16> to vector<1x8x8xbf16>
    %85 = vector.shape_cast %81 : vector<8x8xbf16> to vector<1x8x8xbf16>
    %86 = tpu.concatenate %82, %83, %84, %85 in 0 : vector<1x8x8xbf16>, vector<1x8x8xbf16>, vector<1x8x8xbf16>, vector<1x8x8xbf16> -> vector<4x8x8xbf16>
    "tpu.trace_start"() <{level = 10 : i32, message = "bqd,bkd->bqk"}> : () -> ()
    %cst_29 = arith.constant dense<0.000000e+00> : vector<4x8x8xf32>
    %87 = tpu.matmul %68, %77, %cst_29 {dimension_numbers = #tpu.dot_dimension_numbers<[2], [2], [1], [1], [0, 0, 0, 1, 1, 1], [0], [0]>} : vector<4x8x8xbf16>, vector<4x8x8xbf16>, vector<4x8x8xf32> -> vector<4x8x8xf32>
    "tpu.trace_stop"() : () -> ()
    %cst_30 = arith.constant dense<0xFF800000> : vector<4x8xf32>
    %88 = vector.multi_reduction <maximumf>, %87, %cst_30 [2] : vector<4x8x8xf32> to vector<4x8xf32>
    %89 = vector.shape_cast %88 : vector<4x8xf32> to vector<4x8x1xf32>
    %90 = vector.broadcast %89 : vector<4x8x1xf32> to vector<4x8x8xf32>
    %91 = arith.subf %87, %90 : vector<4x8x8xf32>
    %92 = math.exp %91 : vector<4x8x8xf32>
    %cst_31 = arith.constant dense<0.000000e+00> : vector<4x8xf32>
    %93 = vector.multi_reduction <add>, %92, %cst_31 [2] : vector<4x8x8xf32> to vector<4x8xf32>
    %94 = vector.shape_cast %93 : vector<4x8xf32> to vector<4x8x1xf32>
    %95 = vector.broadcast %94 : vector<4x8x1xf32> to vector<4x8x8xf32>
    %96 = arith.divf %92, %95 : vector<4x8x8xf32>
    %97 = vector.shape_cast %96 : vector<4x8x8xf32> to vector<1x4x8x8xf32>
    %c0_32 = arith.constant 0 : index
    %c0_33 = arith.constant 0 : index
    %c0_34 = arith.constant 0 : index
    %c0_35 = arith.constant 0 : index
    %98 = vector.load %arg19[%c0_32, %c0_33, %c0_34, %c0_35] : memref<1x4x8x8xf32, #tpu.memory_space<vmem>>, vector<1x4x8x8xf32>
    tpu.vector_store %arg19[%c0_32, %c0_33, %c0_34, %c0_35], %97 {strides = array<i32>} : memref<1x4x8x8xf32, #tpu.memory_space<vmem>>, vector<1x4x8x8xf32>,
    %99 = arith.truncf %96 : vector<4x8x8xf32> to vector<4x8x8xbf16>
    "tpu.trace_start"() <{level = 10 : i32, message = "bqk,bkd->bqd"}> : () -> ()
    %cst_36 = arith.constant dense<0.000000e+00> : vector<4x8x8xf32>
    %100 = tpu.matmul %99, %86, %cst_36 {dimension_numbers = #tpu.dot_dimension_numbers<[2], [1], [1], [2], [0, 0, 0, 1, 1, 2], [0], [0]>} : vector<4x8x8xbf16>, vector<4x8x8xbf16>, vector<4x8x8xf32> -> vector<4x8x8xf32>
    "tpu.trace_stop"() : () -> ()
    %101 = vector.extract_strided_slice %100 {offsets = [0, 0, 0], sizes = [1, 8, 8], strides = [1, 1, 1]} : vector<4x8x8xf32> to vector<1x8x8xf32>
    %102 = vector.shape_cast %101 : vector<1x8x8xf32> to vector<8x8xf32>
    %103 = vector.extract_strided_slice %100 {offsets = [1, 0, 0], sizes = [1, 8, 8], strides = [1, 1, 1]} : vector<4x8x8xf32> to vector<1x8x8xf32>
    %104 = vector.shape_cast %103 : vector<1x8x8xf32> to vector<8x8xf32>
    %105 = vector.extract_strided_slice %100 {offsets = [2, 0, 0], sizes = [1, 8, 8], strides = [1, 1, 1]} : vector<4x8x8xf32> to vector<1x8x8xf32>
    %106 = vector.shape_cast %105 : vector<1x8x8xf32> to vector<8x8xf32>
    %107 = vector.extract_strided_slice %100 {offsets = [3, 0, 0], sizes = [1, 8, 8], strides = [1, 1, 1]} : vector<4x8x8xf32> to vector<1x8x8xf32>
    %108 = vector.shape_cast %107 : vector<1x8x8xf32> to vector<8x8xf32>
    %109 = tpu.concatenate %102, %104, %106, %108 in 1 : vector<8x8xf32>, vector<8x8xf32>, vector<8x8xf32>, vector<8x8xf32> -> vector<8x32xf32>
    %110 = arith.truncf %109 : vector<8x32xf32> to vector<8x32xbf16>
    %c0_37 = arith.constant 0 : index
    %c0_38 = arith.constant 0 : index
    %111 = vector.load %arg10[%c0_37, %c0_38] : memref<32x32xbf16, #tpu.memory_space<vmem>>, vector<32x32xbf16>
    %cst_39 = arith.constant dense<0.000000e+00> : vector<8x32xf32>
    %112 = tpu.matmul %110, %111, %cst_39 {dimension_numbers = #tpu.dot_dimension_numbers<[1], [0], [0], [1], [0, 0, 1, 1], [], []>} : vector<8x32xbf16>, vector<32x32xbf16>, vector<8x32xf32> -> vector<8x32xf32>
    %c0_40 = arith.constant 0 : index
    %c0_41 = arith.constant 0 : index
    %113 = vector.load %arg11[%c0_40, %c0_41] : memref<1x32xf32, #tpu.memory_space<vmem>>, vector<1x32xf32>
    %114 = vector.shape_cast %113 : vector<1x32xf32> to vector<32xf32>
    %115 = vector.shape_cast %114 : vector<32xf32> to vector<1x32xf32>
    %116 = vector.broadcast %115 : vector<1x32xf32> to vector<8x32xf32>
    %117 = arith.addf %112, %116 : vector<8x32xf32>
    %118 = arith.addf %117, %8 : vector<8x32xf32>
    %cst_42 = arith.constant dense<0.000000e+00> : vector<8xf32>
    %119 = vector.multi_reduction <add>, %118, %cst_42 [1] : vector<8x32xf32> to vector<8xf32>
    %120 = vector.shape_cast %119 : vector<8xf32> to vector<8x1xf32>
    %cst_43 = arith.constant 3.200000e+01 : f32
    %121 = vector.broadcast %cst_43 : f32 to vector<8x1xf32>
    %122 = arith.divf %120, %121 : vector<8x1xf32>
    %123 = vector.broadcast %122 : vector<8x1xf32> to vector<8x32xf32>
    %124 = arith.subf %118, %123 : vector<8x32xf32>
    %125 = arith.mulf %124, %124 : vector<8x32xf32>
    %cst_44 = arith.constant dense<0.000000e+00> : vector<8xf32>
    %126 = vector.multi_reduction <add>, %125, %cst_44 [1] : vector<8x32xf32> to vector<8xf32>
    %127 = vector.shape_cast %126 : vector<8xf32> to vector<8x1xf32>
    %cst_45 = arith.constant 3.200000e+01 : f32
    %128 = vector.broadcast %cst_45 : f32 to vector<8x1xf32>
    %129 = arith.divf %127, %128 : vector<8x1xf32>
    %130 = vector.broadcast %122 : vector<8x1xf32> to vector<8x32xf32>
    %131 = arith.subf %118, %130 : vector<8x32xf32>
    %cst_46 = arith.constant 9.99999993E-9 : f32
    %132 = vector.broadcast %cst_46 : f32 to vector<8x1xf32>
    %133 = arith.addf %129, %132 : vector<8x1xf32>
    %134 = math.rsqrt %133 : vector<8x1xf32>
    %135 = vector.broadcast %134 : vector<8x1xf32> to vector<8x32xf32>
    %136 = arith.mulf %131, %135 : vector<8x32xf32>
    %137 = vector.shape_cast %5 : vector<32xf32> to vector<1x32xf32>
    %138 = vector.broadcast %137 : vector<1x32xf32> to vector<8x32xf32>
    %139 = arith.mulf %136, %138 : vector<8x32xf32>
    %140 = vector.shape_cast %7 : vector<32xf32> to vector<1x32xf32>
    %141 = vector.broadcast %140 : vector<1x32xf32> to vector<8x32xf32>
    %142 = arith.addf %139, %141 : vector<8x32xf32>
    %143 = arith.truncf %142 : vector<8x32xf32> to vector<8x32xbf16>
    %c0_47 = arith.constant 0 : index
    %c0_48 = arith.constant 0 : index
    %144 = vector.load %arg14[%c0_47, %c0_48] : memref<32x64xbf16, #tpu.memory_space<vmem>>, vector<32x64xbf16>
    %cst_49 = arith.constant dense<0.000000e+00> : vector<8x64xf32>
    %145 = tpu.matmul %143, %144, %cst_49 {dimension_numbers = #tpu.dot_dimension_numbers<[1], [0], [0], [1], [0, 0, 1, 1], [], []>} : vector<8x32xbf16>, vector<32x64xbf16>, vector<8x64xf32> -> vector<8x64xf32>
    %c0_50 = arith.constant 0 : index
    %c0_51 = arith.constant 0 : index
    %146 = vector.load %arg15[%c0_50, %c0_51] : memref<1x64xf32, #tpu.memory_space<vmem>>, vector<1x64xf32>
    %147 = vector.shape_cast %146 : vector<1x64xf32> to vector<64xf32>
    %148 = vector.shape_cast %147 : vector<64xf32> to vector<1x64xf32>
    %149 = vector.broadcast %148 : vector<1x64xf32> to vector<8x64xf32>
    %150 = arith.addf %145, %149 : vector<8x64xf32>
    %cst_52 = arith.constant 5.000000e-01 : f32
    %151 = vector.broadcast %cst_52 : f32 to vector<8x64xf32>
    %152 = arith.mulf %151, %150 : vector<8x64xf32>
    %cst_53 = arith.constant 4.471500e-02 : f32
    %153 = vector.broadcast %cst_53 : f32 to vector<8x64xf32>
    %154 = arith.mulf %153, %150 : vector<8x64xf32>
    %155 = arith.mulf %154, %150 : vector<8x64xf32>
    %156 = arith.mulf %155, %150 : vector<8x64xf32>
    %157 = arith.addf %150, %156 : vector<8x64xf32>
    %cst_54 = arith.constant 0.797884583 : f32
    %158 = vector.broadcast %cst_54 : f32 to vector<8x64xf32>
    %159 = arith.mulf %158, %157 : vector<8x64xf32>
    %160 = math.tanh %159 : vector<8x64xf32>
    %cst_55 = arith.constant 1.000000e+00 : f32
    %161 = vector.broadcast %cst_55 : f32 to vector<8x64xf32>
    %162 = arith.addf %161, %160 : vector<8x64xf32>
    %163 = arith.mulf %152, %162 : vector<8x64xf32>
    %164 = arith.truncf %163 : vector<8x64xf32> to vector<8x64xbf16>
    %c0_56 = arith.constant 0 : index
    %c0_57 = arith.constant 0 : index
    %165 = vector.load %arg16[%c0_56, %c0_57] : memref<64x32xbf16, #tpu.memory_space<vmem>>, vector<64x32xbf16>
    %cst_58 = arith.constant dense<0.000000e+00> : vector<8x32xf32>
    %166 = tpu.matmul %164, %165, %cst_58 {dimension_numbers = #tpu.dot_dimension_numbers<[1], [0], [0], [1], [0, 0, 1, 1], [], []>} : vector<8x64xbf16>, vector<64x32xbf16>, vector<8x32xf32> -> vector<8x32xf32>
    %c0_59 = arith.constant 0 : index
    %c0_60 = arith.constant 0 : index
    %167 = vector.load %arg17[%c0_59, %c0_60] : memref<1x32xf32, #tpu.memory_space<vmem>>, vector<1x32xf32>
    %168 = vector.shape_cast %167 : vector<1x32xf32> to vector<32xf32>
    %169 = vector.shape_cast %168 : vector<32xf32> to vector<1x32xf32>
    %170 = vector.broadcast %169 : vector<1x32xf32> to vector<8x32xf32>
    %171 = arith.addf %166, %170 : vector<8x32xf32>
    %172 = arith.addf %171, %118 : vector<8x32xf32>
    %c0_61 = arith.constant 0 : index
    %c0_62 = arith.constant 0 : index
    %173 = vector.load %arg18[%c0_61, %c0_62] : memref<8x32xf32, #tpu.memory_space<vmem>>, vector<8x32xf32>
    tpu.vector_store %arg18[%c0_61, %c0_62], %172 {strides = array<i32>} : memref<8x32xf32, #tpu.memory_space<vmem>>, vector<8x32xf32>,
    return
  }
  func.func @transform_0(%arg0: i32) -> (i32, i32) {
    %c0_i32 = arith.constant 0 : i32
    %c0_i32_0 = arith.constant 0 : i32
    return %arg0, %c0_i32 : i32, i32
  }
  func.func @transform_1(%arg0: i32) -> (i32, i32) {
    %c0_i32 = arith.constant 0 : i32
    %c0_i32_0 = arith.constant 0 : i32
    %c0_i32_1 = arith.constant 0 : i32
    return %c0_i32, %c0_i32_0 : i32, i32
  }
  func.func @transform_2(%arg0: i32) -> (i32, i32) {
    %c0_i32 = arith.constant 0 : i32
    %c0_i32_0 = arith.constant 0 : i32
    %c0_i32_1 = arith.constant 0 : i32
    return %c0_i32, %c0_i32_0 : i32, i32
  }
  func.func @transform_3(%arg0: i32) -> (i32, i32) {
    %c0_i32 = arith.constant 0 : i32
    %c0_i32_0 = arith.constant 0 : i32
    %c0_i32_1 = arith.constant 0 : i32
    return %c0_i32, %c0_i32_0 : i32, i32
  }
  func.func @transform_4(%arg0: i32) -> (i32, i32) {
    %c0_i32 = arith.constant 0 : i32
    %c0_i32_0 = arith.constant 0 : i32
    %c0_i32_1 = arith.constant 0 : i32
    return %c0_i32, %c0_i32_0 : i32, i32
  }
  func.func @transform_5(%arg0: i32) -> (i32, i32) {
    %c0_i32 = arith.constant 0 : i32
    %c0_i32_0 = arith.constant 0 : i32
    %c0_i32_1 = arith.constant 0 : i32
    return %c0_i32, %c0_i32_0 : i32, i32
  }
  func.func @transform_6(%arg0: i32) -> (i32, i32) {
    %c0_i32 = arith.constant 0 : i32
    %c0_i32_0 = arith.constant 0 : i32
    %c0_i32_1 = arith.constant 0 : i32
    return %c0_i32, %c0_i32_0 : i32, i32
  }
  func.func @transform_7(%arg0: i32) -> (i32, i32) {
    %c0_i32 = arith.constant 0 : i32
    %c0_i32_0 = arith.constant 0 : i32
    %c0_i32_1 = arith.constant 0 : i32
    return %c0_i32, %c0_i32_0 : i32, i32
  }
  func.func @transform_8(%arg0: i32) -> (i32, i32) {
    %c0_i32 = arith.constant 0 : i32
    %c0_i32_0 = arith.constant 0 : i32
    %c0_i32_1 = arith.constant 0 : i32
    return %c0_i32, %c0_i32_0 : i32, i32
  }
  func.func @transform_9(%arg0: i32) -> (i32, i32) {
    %c0_i32 = arith.constant 0 : i32
    %c0_i32_0 = arith.constant 0 : i32
    %c0_i32_1 = arith.constant 0 : i32
    return %c0_i32, %c0_i32_0 : i32, i32
  }
  func.func @transform_10(%arg0: i32) -> (i32, i32) {
    %c0_i32 = arith.constant 0 : i32
    %c0_i32_0 = arith.constant 0 : i32
    %c0_i32_1 = arith.constant 0 : i32
    return %c0_i32, %c0_i32_0 : i32, i32
  }
  func.func @transform_11(%arg0: i32) -> (i32, i32) {
    %c0_i32 = arith.constant 0 : i32
    %c0_i32_0 = arith.constant 0 : i32
    %c0_i32_1 = arith.constant 0 : i32
    return %c0_i32, %c0_i32_0 : i32, i32
  }
  func.func @transform_12(%arg0: i32) -> (i32, i32) {
    %c0_i32 = arith.constant 0 : i32
    %c0_i32_0 = arith.constant 0 : i32
    %c0_i32_1 = arith.constant 0 : i32
    return %c0_i32, %c0_i32_0 : i32, i32
  }
  func.func @transform_13(%arg0: i32) -> (i32, i32) {
    %c0_i32 = arith.constant 0 : i32
    %c0_i32_0 = arith.constant 0 : i32
    %c0_i32_1 = arith.constant 0 : i32
    return %c0_i32, %c0_i32_0 : i32, i32
  }
  func.func @transform_14(%arg0: i32) -> (i32, i32) {
    %c0_i32 = arith.constant 0 : i32
    %c0_i32_0 = arith.constant 0 : i32
    %c0_i32_1 = arith.constant 0 : i32
    return %c0_i32, %c0_i32_0 : i32, i32
  }
  func.func @transform_15(%arg0: i32) -> (i32, i32) {
    %c0_i32 = arith.constant 0 : i32
    %c0_i32_0 = arith.constant 0 : i32
    %c0_i32_1 = arith.constant 0 : i32
    return %c0_i32, %c0_i32_0 : i32, i32
  }
  func.func @transform_16(%arg0: i32) -> (i32, i32) {
    %c0_i32 = arith.constant 0 : i32
    %c0_i32_0 = arith.constant 0 : i32
    %c0_i32_1 = arith.constant 0 : i32
    return %c0_i32, %c0_i32_0 : i32, i32
  }
  func.func @transform_17(%arg0: i32) -> (i32, i32) {
    %c0_i32 = arith.constant 0 : i32
    %c0_i32_0 = arith.constant 0 : i32
    return %arg0, %c0_i32 : i32, i32
  }
  func.func @transform_18(%arg0: i32) -> (i32, i32, i32, i32) {
    %c0_i32 = arith.constant 0 : i32
    %c0_i32_0 = arith.constant 0 : i32
    %c0_i32_1 = arith.constant 0 : i32
    %c0_i32_2 = arith.constant 0 : i32
    return %arg0, %c0_i32, %c0_i32_0, %c0_i32_1 : i32, i32, i32, i32
  }
}

</mosaic_0001>

<bundles_post_ra>
// kernel: tpu_custom_call.1
= control target key start
LH: loop header
LB: loop body
LE: loop exit
PB: predicated region body
PF: predicated region fallthrough
CT: control target
= control target key end

     0   :  { %s3968_s0 = inlined_call_operand.hbm [shape: f32[16,32], index: 0, kind: input, shape index: {}]   ;;  %s3969_s1 = inlined_call_operand.hbm [shape: f32[1,32], index: 1, kind: input, shape index: {}]   ;;  %s3970_s2 = inlined_call_operand.hbm [shape: f32[1,32], index: 2, kind: input, shape index: {}]   ;;  %s3971_s3 = inlined_call_operand.hbm [shape: bf16[32,32], index: 3, kind: input, shape index: {}]   ;;  %s3972_s4 = inlined_call_operand.hbm [shape: f32[1,32], index: 4, kind: input, shape index: {}]   ;;  %s3973_s5 = inlined_call_operand.hbm [shape: bf16[32,32], index: 5, kind: input, shape index: {}]   ;;  %s3974_s6 = inlined_call_operand.hbm [shape: f32[1,32], index: 6, kind: input, shape index: {}]   ;;  %s3975_s7 = inlined_call_operand.hbm [shape: bf16[32,32], index: 7, kind: input, shape index: {}]   ;;  %s3976_s8 = inlined_call_operand.hbm [shape: f32[1,32], index: 8, kind: input, shape index: {}]   ;;  %s3977_s9 = inlined_call_operand.hbm [shape: bf16[32,32], index: 9, kind: input, shape index: {}]   ;;  %s3978_s10 = inlined_call_operand.hbm [shape: f32[1,32], index: 10, kind: input, shape index: {}]   ;;  %s3979_s11 = inlined_call_operand.hbm [shape: f32[1,32], index: 11, kind: input, shape index: {}]   ;;  %s3980_s12 = inlined_call_operand.hbm [shape: f32[1,32], index: 12, kind: input, shape index: {}]   ;;  %s3981_s13 = inlined_call_operand.hbm [shape: bf16[32,64], index: 13, kind: input, shape index: {}]   ;;  %s3982_s14 = inlined_call_operand.hbm [shape: f32[1,64], index: 14, kind: input, shape index: {}]   ;;  %s3983_s15 = inlined_call_operand.hbm [shape: bf16[64,32], index: 15, kind: input, shape index: {}]   ;;  %s3984_s16 = inlined_call_operand.hbm [shape: f32[1,32], index: 16, kind: input, shape index: {}]   ;;  %s3985_s17 = inlined_call_operand.hbm [shape: f32[16,32], index: 17, kind: output, shape index: {0}]   ;;  %s3986_s18 = inlined_call_operand.hbm [shape: f32[2,4,8,8], index: 18, kind: output, shape index: {1}]  }
   0x1   :  { %4004 = sst [smem:[#allocation48_spill]] %s3968_s0 }
   0x2   :  { %4005 = sst [smem:[#allocation49_spill]] %s3969_s1 }
   0x3   :  { %4006 = sst [smem:[#allocation50_spill]] %s3970_s2 }
   0x4   :  { %4007 = sst [smem:[#allocation51_spill]] %s3971_s3 }
   0x5   :  { %4008 = sst [smem:[#allocation52_spill]] %s3972_s4 }
   0x6   :  { %4009 = sst [smem:[#allocation53_spill]] %s3973_s5 }
   0x7   :  { %4010 = sst [smem:[#allocation54_spill]] %s3974_s6 }
   0x8   :  { %4011 = sst [smem:[#allocation55_spill]] %s3975_s7 }
   0x9   :  { %4012 = sst [smem:[#allocation56_spill]] %s3976_s8 }
   0xa   :  { %4013 = sst [smem:[#allocation57_spill]] %s3985_s17 }
   0xb   :  { %4014 = sst [smem:[#allocation58_spill]] %s3986_s18 }
   0xc   :  { %24 = vsyncpa [#allocation3], 0 }
   0xd   :  { %26 = vsyncpa [#allocation3 + $0x1], 0 }
   0xe   :  { %27 = vsyncpa [#allocation6], 0 }
   0xf   :  { %28 = vsyncpa [#allocation9], 0 }
  0x10   :  { %29 = vsyncpa [#allocation12], 0 }
  0x11   :  { %30 = vsyncpa [#allocation15], 0 }
  0x12   :  { %31 = vsyncpa [#allocation18], 0 }
  0x13   :  { %32 = vsyncpa [#allocation21], 0 }
  0x14   :  { %33 = vsyncpa [#allocation24], 0 }
  0x15   :  { %34 = vsyncpa [#allocation27], 0 }
  0x16   :  { %35 = vsyncpa [#allocation4], 0 }
  0x17   :  { %37 = vsyncpa [#allocation4 + $0x1], 0 }
  0x18   :  { %38 = vsyncpa [#allocation31], 0 }
  0x19   :  { %40 = vsyncpa [#allocation31 + $0x1], 0  ;;  %s3269_s27 = smov 0   ;;  %s3271_s28 = smov 0  }
  0x1a   :  { %s3273_s29 = smov 0   ;;  %s3275_s30 = smov 0  }
  0x1b LB: > { %4015 = sst [smem:[#allocation43_spill]] %s3130_s27  ;;  %s3144_s0 = smov [#allocation5]   ;;  %s3142_s30 = sphi %s3275_s30, %s4074_s30   ;;  %s3138_s29 = sphi %s3273_s29, %s4073_s29   ;;  %s3134_s28 = sphi %s3271_s28, %s4072_s28   ;;  %s3130_s27 = sphi %s3269_s27, %s4071_s27  }
  0x1c   : > { %4016 = sst [smem:[#allocation44_spill]] %s3134_s28  ;;  %s478_s19 = sshll.u32 %s3144_s0, 4  ;;  %s3295_s19 = int_to_ptr.vmem [resolvable:$true] %s478_s19 }
  0x1d   : > { %4017 = sst [smem:[#allocation45_spill]] %s3138_s29  ;;  %s3290_s1 = sadd.s32 4294967295, %s3142_s30  }
  0x1e   : > { %4018 = sst [smem:[#allocation46_spill]] %s3290_s1  ;;  %p2053_p0 = scmp.ge.s32.totalorder %s3142_s30, 1 }
  0x1f   : > { %p3999_p1 = scmp.eq.s32.totalorder %s3290_s1, 0  ;;  %p465_p2 = scmp.lt.s32.totalorder %s3142_s30, 3 }
  0x20   : > { %s3145_s21 = smov [#allocation8]   ;;  %s3146_s23 = smov [#allocation11]  }
  0x21   : > { %p3297_p3 = pnand %p2053_p0, %p465_p2  ;;  %s499_s22 = sshll.u32 %s3145_s21, 4  ;;  %s3304_s22 = int_to_ptr.vmem [resolvable:$true] %s499_s22 }
  0x22   : > { %s523_s24 = sshll.u32 %s3146_s23, 4  ;;  %s4022_s0 = sld [smem:[#allocation49_spill]]  ;;  %s3312_s24 = int_to_ptr.vmem [resolvable:$true] %s523_s24 }
  0x23   : > { %s4019_s20 = scalar_select %p3297_p3, 1, 0 }
  0x24   : > { %p2345_p5 = pneg %p3297_p3 }
  0x25   : > { %4020 = sst [smem:[#allocation47_spill]] %s4019_s20 }
  0x26   : > { %p3308_p6 = pnand %p2345_p5, %p3999_p1 }
  0x28   : > { %s2534_s17 = scalar_lea.hbm %s4022_s0, 16  ;;  %p3322_p8 = pneg %p3308_p6 }
  0x29   : > { %p2535_p7 = scmp.ne.s32.totalorder %s4022_s0, %s2534_s17  ;;  %p2541_p11 = scmp.lt.u32.totalorder %s2534_s17, %s4022_s0 }
  0x2b   : > { %p2537_p9 = pnand %p3322_p8, %p2535_p7 }
  0x2d   : > { %p2538_p10 = pneg %p2537_p9 }
  0x2f   : > { %p2543_p12 = pnand %p2541_p11, %p2538_p10 }
  0x31   : > { %2546 = shalt.err (!%p2543_p12)
}
  0x32   : > { %s2547_s18 = scalar_lea.vmem %s3295_s19, 16  ;;  %s2554_s20 = scalar_lea.vmem %s3295_s19, 32 }
  0x33   : > { %p2548_p13 = scmp.ne.s32.totalorder %s3295_s19, %s2547_s18  ;;  %p2555_p5 = scmp.lt.s32.totalorder %s3295_s19, %s3295_s19 }
  0x34   : > { %p2556_p7 = scmp.lt.s32.totalorder %s2554_s20, %s2547_s18 }
  0x35   : > { %p2550_p0 = pnand %p2548_p13, %p3322_p8 }
  0x36   : > { %p2557_p9 = por %p2556_p7, %p2555_p5 }
  0x37   : > { %p2551_p2 = pneg %p2550_p0 }
  0x39   : > { %p2558_p4 = pnand %p2557_p9, %p2551_p2 }
  0x3b   : > { %2561 = shalt.err (!%p2558_p4)
}
  0x3c   : > { %2348 = dma.hbm_to_vmem [thread:$0]  (!%p3308_p6), %s4022_s0, 16, %s3295_s19, [#allocation6]  }
  0x3d   : > { %s4024_s3 = sld [smem:[#allocation51_spill]] }
  0x43   : > { %s2562_s23 = scalar_lea.hbm %s4024_s3, 256 }
  0x44   : > { %p2563_p10 = scmp.ne.s32.totalorder %s4024_s3, %s2562_s23  ;;  %p2569_p4 = scmp.lt.u32.totalorder %s2562_s23, %s4024_s3 }
  0x46   : > { %p2565_p11 = pnand %p2563_p10, %p3322_p8 }
  0x48   : > { %p2566_p12 = pneg %p2565_p11 }
  0x4a   : > { %p2571_p13 = pnand %p2569_p4, %p2566_p12 }
  0x4c   : > { %2574 = shalt.err (!%p2571_p13)
}
  0x4d   : > { %s2575_s19 = scalar_lea.vmem %s3304_s22, 256  ;;  %p2583_p7 = scmp.lt.s32.totalorder %s3304_s22, %s3304_s22 }
  0x4e   : > { %p2576_p0 = scmp.ne.s32.totalorder %s3304_s22, %s2575_s19  ;;  %p2584_p9 = scmp.lt.s32.totalorder %s2575_s19, %s2575_s19 }
  0x50   : > { %p2578_p2 = pnand %p2576_p0, %p3322_p8  ;;  %p2585_p10 = por %p2584_p9, %p2583_p7 }
  0x52   : > { %p2579_p5 = pneg %p2578_p2 }
  0x54   : > { %p2586_p11 = pnand %p2585_p10, %p2579_p5 }
  0x56   : > { %2589 = shalt.err (!%p2586_p11)
}
  0x57   : > { %s3147_s27 = smov 64   ;;  %s3148_s28 = smov 4  }
  0x58   : > { %2354 = dma.hbm_to_vmem [thread:$0]  (!%p3308_p6), %s4024_s3, 256, %s3304_s22, [#allocation9], %s3147_s27, %s3147_s27, %s3148_s28  }
  0x59   : > { %s4025_s5 = sld [smem:[#allocation53_spill]] }
  0x5f   : > { %s2590_s23 = scalar_lea.hbm %s4025_s5, 256 }
  0x60   : > { %p2591_p12 = scmp.ne.s32.totalorder %s4025_s5, %s2590_s23  ;;  %p2597_p0 = scmp.lt.u32.totalorder %s2590_s23, %s4025_s5 }
  0x62   : > { %p2593_p4 = pnand %p2591_p12, %p3322_p8 }
  0x64   : > { %p2594_p13 = pneg %p2593_p4 }
  0x66   : > { %p2599_p2 = pnand %p2597_p0, %p2594_p13 }
  0x68   : > { %2602 = shalt.err (!%p2599_p2)
}
  0x69   : > { %s2603_s22 = scalar_lea.vmem %s3312_s24, 256  ;;  %p2611_p10 = scmp.lt.s32.totalorder %s3312_s24, %s3312_s24 }
  0x6a   : > { %p2604_p5 = scmp.ne.s32.totalorder %s3312_s24, %s2603_s22  ;;  %p2612_p11 = scmp.lt.s32.totalorder %s2603_s22, %s2603_s22 }
  0x6c   : > { %p2606_p7 = pnand %p2604_p5, %p3322_p8  ;;  %p2613_p12 = por %p2612_p11, %p2611_p10 }
  0x6e   : > { %p2607_p9 = pneg %p2606_p7 }
  0x70   : > { %p2614_p4 = pnand %p2613_p12, %p2607_p9 }
  0x72   : > { %2617 = shalt.err (!%p2614_p4)
}
  0x73   : > { %2360 = dma.hbm_to_vmem [thread:$0]  (!%p3308_p6), %s4025_s5, 256, %s3312_s24, [#allocation12], %s3147_s27, %s3147_s27, %s3148_s28  }
  0x74   : > { %s3149_s1 = smov [#allocation14]   ;;  %s3150_s26 = smov [#allocation17]  }
  0x75   : > { %s547_s25 = sshll.u32 %s3149_s1, 4  ;;  %s571_s23 = sshll.u32 %s3150_s26, 4  ;;  %s548_s25 = int_to_ptr.vmem [resolvable:$true] %s547_s25  ;;  %s572_s23 = int_to_ptr.vmem [resolvable:$true] %s571_s23 }
  0x76   : > { %s4026_s7 = sld [smem:[#allocation55_spill]] }
  0x7c   : > { %s2618_s19 = scalar_lea.hbm %s4026_s7, 256 }
  0x7d   : > { %p2619_p13 = scmp.ne.s32.totalorder %s4026_s7, %s2618_s19  ;;  %p2625_p5 = scmp.lt.u32.totalorder %s2618_s19, %s4026_s7 }
  0x7f   : > { %p2621_p0 = pnand %p2619_p13, %p3322_p8 }
  0x81   : > { %p2622_p2 = pneg %p2621_p0 }
  0x83   : > { %p2627_p7 = pnand %p2625_p5, %p2622_p2 }
  0x85   : > { %2630 = shalt.err (!%p2627_p7)
}
  0x86   : > { %s2631_s24 = scalar_lea.vmem %s548_s25, 256  ;;  %p2639_p12 = scmp.lt.s32.totalorder %s548_s25, %s548_s25 }
  0x87   : > { %p2632_p9 = scmp.ne.s32.totalorder %s548_s25, %s2631_s24  ;;  %p2640_p4 = scmp.lt.s32.totalorder %s2631_s24, %s2631_s24 }
  0x89   : > { %p2634_p10 = pnand %p2632_p9, %p3322_p8  ;;  %p2641_p1 = por %p2640_p4, %p2639_p12 }
  0x8b   : > { %p2635_p11 = pneg %p2634_p10 }
  0x8d   : > { %p2642_p3 = pnand %p2641_p1, %p2635_p11 }
  0x8f   : > { %2645 = shalt.err (!%p2642_p3)
}
  0x90   : > { %2366 = dma.hbm_to_vmem [thread:$0]  (!%p3308_p6), %s4026_s7, 256, %s548_s25, [#allocation15], %s3147_s27, %s3147_s27, %s3148_s28  }
  0x91   : > { %s2646_s26 = scalar_lea.hbm %s3977_s9, 256 }
  0x92   : > { %p2647_p1 = scmp.ne.s32.totalorder %s3977_s9, %s2646_s26  ;;  %p2653_p0 = scmp.lt.u32.totalorder %s2646_s26, %s3977_s9 }
  0x94   : > { %p2649_p3 = pnand %p2647_p1, %p3322_p8 }
  0x96   : > { %p2650_p13 = pneg %p2649_p3 }
  0x98   : > { %p2655_p2 = pnand %p2653_p0, %p2650_p13 }
  0x9a   : > { %2658 = shalt.err (!%p2655_p2)
}
  0x9b   : > { %s2659_s0 = scalar_lea.vmem %s572_s23, 256  ;;  %p2667_p10 = scmp.lt.s32.totalorder %s572_s23, %s572_s23 }
  0x9c   : > { %p2660_p5 = scmp.ne.s32.totalorder %s572_s23, %s2659_s0  ;;  %p2668_p11 = scmp.lt.s32.totalorder %s2659_s0, %s2659_s0 }
  0x9e   : > { %p2662_p7 = pnand %p2660_p5, %p3322_p8  ;;  %p2669_p12 = por %p2668_p11, %p2667_p10 }
  0xa0   : > { %p2663_p9 = pneg %p2662_p7 }
  0xa2   : > { %p2670_p4 = pnand %p2669_p12, %p2663_p9 }
  0xa4   : > { %2673 = shalt.err (!%p2670_p4)
}
  0xa5   : > { %2372 = dma.hbm_to_vmem [thread:$0]  (!%p3308_p6), %s3977_s9, 256, %s572_s23, [#allocation18], %s3147_s27, %s3147_s27, %s3148_s28  }
  0xa6   : > { %s3151_s3 = smov [#allocation20]   ;;  %s3152_s17 = smov [#allocation23]  }
  0xa7   : > { %s596_s29 = sshll.u32 %s3151_s3, 4  ;;  %s617_s1 = sshll.u32 %s3152_s17, 4  ;;  %s597_s29 = int_to_ptr.vmem [resolvable:$true] %s596_s29  ;;  %s618_s1 = int_to_ptr.vmem [resolvable:$true] %s617_s1 }
  0xa8   : > { %s2674_s20 = scalar_lea.hbm %s3979_s11, 16 }
  0xa9   : > { %p2675_p1 = scmp.ne.s32.totalorder %s3979_s11, %s2674_s20  ;;  %p2681_p0 = scmp.lt.u32.totalorder %s2674_s20, %s3979_s11 }
  0xab   : > { %p2677_p3 = pnand %p2675_p1, %p3322_p8 }
  0xad   : > { %p2678_p13 = pneg %p2677_p3 }
  0xaf   : > { %p2683_p2 = pnand %p2681_p0, %p2678_p13 }
  0xb1   : > { %2686 = shalt.err (!%p2683_p2)
}
  0xb2   : > { %s2687_s23 = scalar_lea.vmem %s597_s29, 16  ;;  %s2694_s24 = scalar_lea.vmem %s597_s29, 32 }
  0xb3   : > { %p2688_p5 = scmp.ne.s32.totalorder %s597_s29, %s2687_s23  ;;  %p2695_p10 = scmp.lt.s32.totalorder %s597_s29, %s597_s29 }
  0xb4   : > { %p2696_p11 = scmp.lt.s32.totalorder %s2694_s24, %s2687_s23 }
  0xb5   : > { %p2690_p7 = pnand %p2688_p5, %p3322_p8 }
  0xb6   : > { %p2697_p12 = por %p2696_p11, %p2695_p10 }
  0xb7   : > { %p2691_p9 = pneg %p2690_p7 }
  0xb9   : > { %p2698_p4 = pnand %p2697_p12, %p2691_p9 }
  0xbb   : > { %2701 = shalt.err (!%p2698_p4)
}
  0xbc   : > { %2378 = dma.hbm_to_vmem [thread:$0]  (!%p3308_p6), %s3979_s11, 16, %s597_s29, [#allocation21]  }
  0xbd   : > { %s2702_s20 = scalar_lea.hbm %s3981_s13, 256 }
  0xbe   : > { %p2703_p1 = scmp.ne.s32.totalorder %s3981_s13, %s2702_s20  ;;  %p2709_p0 = scmp.lt.u32.totalorder %s2702_s20, %s3981_s13 }
  0xc0   : > { %p2705_p3 = pnand %p2703_p1, %p3322_p8 }
  0xc2   : > { %p2706_p13 = pneg %p2705_p3 }
  0xc4   : > { %p2711_p2 = pnand %p2709_p0, %p2706_p13 }
  0xc6   : > { %2714 = shalt.err (!%p2711_p2)
}
  0xc7   : > { %s2715_s23 = scalar_lea.vmem %s618_s1, 256  ;;  %p2723_p10 = scmp.lt.s32.totalorder %s618_s1, %s618_s1 }
  0xc8   : > { %p2716_p5 = scmp.ne.s32.totalorder %s618_s1, %s2715_s23  ;;  %p2724_p11 = scmp.lt.s32.totalorder %s2715_s23, %s2715_s23 }
  0xca   : > { %p2718_p7 = pnand %p2716_p5, %p3322_p8  ;;  %p2725_p12 = por %p2724_p11, %p2723_p10 }
  0xcc   : > { %p2719_p9 = pneg %p2718_p7 }
  0xce   : > { %p2726_p4 = pnand %p2725_p12, %p2719_p9 }
  0xd0   : > { %2729 = shalt.err (!%p2726_p4)
}
  0xd1   : > { %2384 = dma.hbm_to_vmem [thread:$0]  (!%p3308_p6), %s3981_s13, 256, %s618_s1, [#allocation24], %s3147_s27, %s3147_s27, %s3148_s28  }
  0xd2   : > { %s3153_s3 = smov [#allocation26]   ;;  %s3154_s26 = smov [#allocation7]  }
  0xd3   : > { %s641_s17 = sshll.u32 %s3153_s3, 4  ;;  %s489_s18 = sshll.u32 %s3154_s26, 4  ;;  %s642_s17 = int_to_ptr.vmem [resolvable:$true] %s641_s17  ;;  %s490_s18 = int_to_ptr.vmem [resolvable:$true] %s489_s18 }
  0xd4   : > { %s2730_s22 = scalar_lea.hbm %s3983_s15, 512 }
  0xd5   : > { %p2731_p1 = scmp.ne.s32.totalorder %s3983_s15, %s2730_s22  ;;  %p2737_p0 = scmp.lt.u32.totalorder %s2730_s22, %s3983_s15 }
  0xd7   : > { %p2733_p3 = pnand %p2731_p1, %p3322_p8 }
  0xd9   : > { %p2734_p13 = pneg %p2733_p3 }
  0xdb   : > { %p2739_p2 = pnand %p2737_p0, %p2734_p13 }
  0xdd   : > { %2742 = shalt.err (!%p2739_p2)
}
  0xde   : > { %s2743_s1 = scalar_lea.vmem %s642_s17, 512  ;;  %p2751_p10 = scmp.lt.s32.totalorder %s642_s17, %s642_s17 }
  0xdf   : > { %p2744_p5 = scmp.ne.s32.totalorder %s642_s17, %s2743_s1  ;;  %p2752_p11 = scmp.lt.s32.totalorder %s2743_s1, %s2743_s1 }
  0xe1   : > { %p2746_p7 = pnand %p2744_p5, %p3322_p8  ;;  %p2753_p12 = por %p2752_p11, %p2751_p10 }
  0xe3   : > { %p2747_p9 = pneg %p2746_p7 }
  0xe5   : > { %p2754_p4 = pnand %p2753_p12, %p2747_p9 }
  0xe7   : > { %2757 = shalt.err (!%p2754_p4)
}
  0xe8   : > { %2390 = dma.hbm_to_vmem [thread:$0]  (!%p3308_p6), %s3983_s15, 512, %s642_s17, [#allocation27], %s3147_s27, %s3147_s27, %s3148_s28  }
  0xe9   : > { %s4027_s19 = sld [smem:[#allocation50_spill]] }
  0xef   : > { %s2758_s22 = scalar_lea.hbm %s4027_s19, 16 }
  0xf0   : > { %p2759_p1 = scmp.ne.s32.totalorder %s4027_s19, %s2758_s22  ;;  %p2765_p0 = scmp.lt.u32.totalorder %s2758_s22, %s4027_s19 }
  0xf2   : > { %p2761_p3 = pnand %p2759_p1, %p3322_p8 }
  0xf4   : > { %p2762_p13 = pneg %p2761_p3 }
  0xf6   : > { %p2767_p2 = pnand %p2765_p0, %p2762_p13 }
  0xf8   : > { %2770 = shalt.err (!%p2767_p2)
}
  0xf9   : > { %s2771_s1 = scalar_lea.vmem %s490_s18, 16  ;;  %s2778_s27 = scalar_lea.vmem %s490_s18, 32 }
  0xfa   : > { %p2772_p5 = scmp.ne.s32.totalorder %s490_s18, %s2771_s1  ;;  %p2779_p10 = scmp.lt.s32.totalorder %s490_s18, %s490_s18 }
  0xfb   : > { %p2780_p11 = scmp.lt.s32.totalorder %s2778_s27, %s2771_s1 }
  0xfc   : > { %p2774_p7 = pnand %p2772_p5, %p3322_p8 }
  0xfd   : > { %p2781_p12 = por %p2780_p11, %p2779_p10 }
  0xfe   : > { %p2775_p9 = pneg %p2774_p7 }
 0x100   : > { %p2782_p4 = pnand %p2781_p12, %p2775_p9 }
 0x102   : > { %2785 = shalt.err (!%p2782_p4)
}
 0x103   : > { %2351 = dma.hbm_to_vmem [thread:$0]  (!%p3308_p6), %s4027_s19, 16, %s490_s18, [#allocation6]  }
 0x104   : > { %s3155_s24 = smov [#allocation10]   ;;  %s3156_s26 = smov [#allocation13]  }
 0x105   : > { %s513_s3 = sshll.u32 %s3155_s24, 4  ;;  %s537_s20 = sshll.u32 %s3156_s26, 4  ;;  %s514_s3 = int_to_ptr.vmem [resolvable:$true] %s513_s3  ;;  %s538_s20 = int_to_ptr.vmem [resolvable:$true] %s537_s20 }
 0x106   : > { %s4028_s4 = sld [smem:[#allocation52_spill]] }
 0x10c   : > { %s2786_s25 = scalar_lea.hbm %s4028_s4, 16 }
 0x10d   : > { %p2787_p1 = scmp.ne.s32.totalorder %s4028_s4, %s2786_s25  ;;  %p2793_p0 = scmp.lt.u32.totalorder %s2786_s25, %s4028_s4 }
 0x10f   : > { %p2789_p3 = pnand %p2787_p1, %p3322_p8 }
 0x111   : > { %p2790_p13 = pneg %p2789_p3 }
 0x113   : > { %p2795_p2 = pnand %p2793_p0, %p2790_p13 }
 0x115   : > { %2798 = shalt.err (!%p2795_p2)
}
 0x116   : > { %s2799_s18 = scalar_lea.vmem %s514_s3, 16  ;;  %s2806_s28 = scalar_lea.vmem %s514_s3, 32 }
 0x117   : > { %p2800_p5 = scmp.ne.s32.totalorder %s514_s3, %s2799_s18  ;;  %p2807_p10 = scmp.lt.s32.totalorder %s514_s3, %s514_s3 }
 0x118   : > { %p2808_p11 = scmp.lt.s32.totalorder %s2806_s28, %s2799_s18 }
 0x119   : > { %p2802_p7 = pnand %p2800_p5, %p3322_p8 }
 0x11a   : > { %p2809_p12 = por %p2808_p11, %p2807_p10 }
 0x11b   : > { %p2803_p9 = pneg %p2802_p7 }
 0x11d   : > { %p2810_p4 = pnand %p2809_p12, %p2803_p9 }
 0x11f   : > { %2813 = shalt.err (!%p2810_p4)
}
 0x120   : > { %2357 = dma.hbm_to_vmem [thread:$0]  (!%p3308_p6), %s4028_s4, 16, %s514_s3, [#allocation9]  }
 0x121   : > { %s4029_s6 = sld [smem:[#allocation54_spill]] }
 0x127   : > { %s2814_s0 = scalar_lea.hbm %s4029_s6, 16 }
 0x128   : > { %p2815_p1 = scmp.ne.s32.totalorder %s4029_s6, %s2814_s0  ;;  %p2821_p0 = scmp.lt.u32.totalorder %s2814_s0, %s4029_s6 }
 0x12a   : > { %p2817_p3 = pnand %p2815_p1, %p3322_p8 }
 0x12c   : > { %p2818_p13 = pneg %p2817_p3 }
 0x12e   : > { %p2823_p2 = pnand %p2821_p0, %p2818_p13 }
 0x130   : > { %2826 = shalt.err (!%p2823_p2)
}
 0x131   : > { %s2827_s27 = scalar_lea.vmem %s538_s20, 16  ;;  %s2834_s3 = scalar_lea.vmem %s538_s20, 32 }
 0x132   : > { %p2828_p5 = scmp.ne.s32.totalorder %s538_s20, %s2827_s27  ;;  %p2835_p10 = scmp.lt.s32.totalorder %s538_s20, %s538_s20 }
 0x133   : > { %p2836_p11 = scmp.lt.s32.totalorder %s2834_s3, %s2827_s27 }
 0x134   : > { %p2830_p7 = pnand %p2828_p5, %p3322_p8 }
 0x135   : > { %p2837_p12 = por %p2836_p11, %p2835_p10 }
 0x136   : > { %p2831_p9 = pneg %p2830_p7 }
 0x138   : > { %p2838_p4 = pnand %p2837_p12, %p2831_p9 }
 0x13a   : > { %2841 = shalt.err (!%p2838_p4)
}
 0x13b   : > { %2363 = dma.hbm_to_vmem [thread:$0]  (!%p3308_p6), %s4029_s6, 16, %s538_s20, [#allocation12]  }
 0x13c   : > { %s3157_s17 = smov [#allocation16]   ;;  %s3158_s26 = smov [#allocation19]  }
 0x13d   : > { %s561_s24 = sshll.u32 %s3157_s17, 4  ;;  %s585_s22 = sshll.u32 %s3158_s26, 4  ;;  %s562_s24 = int_to_ptr.vmem [resolvable:$true] %s561_s24  ;;  %s586_s22 = int_to_ptr.vmem [resolvable:$true] %s585_s22 }
 0x13e   : > { %s4030_s8 = sld [smem:[#allocation56_spill]] }
 0x144   : > { %s2842_s23 = scalar_lea.hbm %s4030_s8, 16 }
 0x145   : > { %p2843_p1 = scmp.ne.s32.totalorder %s4030_s8, %s2842_s23  ;;  %p2849_p0 = scmp.lt.u32.totalorder %s2842_s23, %s4030_s8 }
 0x147   : > { %p2845_p3 = pnand %p2843_p1, %p3322_p8 }
 0x149   : > { %p2846_p13 = pneg %p2845_p3 }
 0x14b   : > { %p2851_p2 = pnand %p2849_p0, %p2846_p13 }
 0x14d   : > { %2854 = shalt.err (!%p2851_p2)
}
 0x14e   : > { %s2855_s20 = scalar_lea.vmem %s562_s24, 16  ;;  %s2862_s18 = scalar_lea.vmem %s562_s24, 32 }
 0x14f   : > { %p2856_p5 = scmp.ne.s32.totalorder %s562_s24, %s2855_s20  ;;  %p2863_p10 = scmp.lt.s32.totalorder %s562_s24, %s562_s24 }
 0x150   : > { %p2864_p11 = scmp.lt.s32.totalorder %s2862_s18, %s2855_s20 }
 0x151   : > { %p2858_p7 = pnand %p2856_p5, %p3322_p8 }
 0x152   : > { %p2865_p12 = por %p2864_p11, %p2863_p10 }
 0x153   : > { %p2859_p9 = pneg %p2858_p7 }
 0x155   : > { %p2866_p4 = pnand %p2865_p12, %p2859_p9 }
 0x157   : > { %2869 = shalt.err (!%p2866_p4)
}
 0x158   : > { %2369 = dma.hbm_to_vmem [thread:$0]  (!%p3308_p6), %s4030_s8, 16, %s562_s24, [#allocation15]  }
 0x159   : > { %s2870_s25 = scalar_lea.hbm %s3978_s10, 16 }
 0x15a   : > { %p2871_p1 = scmp.ne.s32.totalorder %s3978_s10, %s2870_s25  ;;  %p2877_p0 = scmp.lt.u32.totalorder %s2870_s25, %s3978_s10 }
 0x15c   : > { %p2873_p3 = pnand %p2871_p1, %p3322_p8 }
 0x15e   : > { %p2874_p13 = pneg %p2873_p3 }
 0x160   : > { %p2879_p2 = pnand %p2877_p0, %p2874_p13 }
 0x162   : > { %2882 = shalt.err (!%p2879_p2)
}
 0x163   : > { %s2883_s3 = scalar_lea.vmem %s586_s22, 16  ;;  %s2890_s24 = scalar_lea.vmem %s586_s22, 32 }
 0x164   : > { %p2884_p5 = scmp.ne.s32.totalorder %s586_s22, %s2883_s3  ;;  %p2891_p10 = scmp.lt.s32.totalorder %s586_s22, %s586_s22 }
 0x165   : > { %p2892_p11 = scmp.lt.s32.totalorder %s2890_s24, %s2883_s3 }
 0x166   : > { %p2886_p7 = pnand %p2884_p5, %p3322_p8 }
 0x167   : > { %p2893_p12 = por %p2892_p11, %p2891_p10 }
 0x168   : > { %p2887_p9 = pneg %p2886_p7 }
 0x16a   : > { %p2894_p4 = pnand %p2893_p12, %p2887_p9 }
 0x16c   : > { %2897 = shalt.err (!%p2894_p4)
}
 0x16d   : > { %2375 = dma.hbm_to_vmem [thread:$0]  (!%p3308_p6), %s3978_s10, 16, %s586_s22, [#allocation18]  }
 0x16e   : > { %s3159_s28 = smov [#allocation22]   ;;  %s3160_s26 = smov [#allocation25]  }
 0x16f   : > { %s607_s17 = sshll.u32 %s3159_s28, 4  ;;  %s631_s0 = sshll.u32 %s3160_s26, 4  ;;  %s608_s17 = int_to_ptr.vmem [resolvable:$true] %s607_s17  ;;  %s632_s0 = int_to_ptr.vmem [resolvable:$true] %s631_s0 }
 0x170   : > { %s2898_s29 = scalar_lea.hbm %s3980_s12, 16 }
 0x171   : > { %p2899_p1 = scmp.ne.s32.totalorder %s3980_s12, %s2898_s29  ;;  %p2905_p0 = scmp.lt.u32.totalorder %s2898_s29, %s3980_s12 }
 0x173   : > { %p2901_p3 = pnand %p2899_p1, %p3322_p8 }
 0x175   : > { %p2902_p13 = pneg %p2901_p3 }
 0x177   : > { %p2907_p2 = pnand %p2905_p0, %p2902_p13 }
 0x179   : > { %2910 = shalt.err (!%p2907_p2)
}
 0x17a   : > { %s2911_s22 = scalar_lea.vmem %s608_s17, 16  ;;  %s2918_s20 = scalar_lea.vmem %s608_s17, 32 }
 0x17b   : > { %p2912_p5 = scmp.ne.s32.totalorder %s608_s17, %s2911_s22  ;;  %p2919_p10 = scmp.lt.s32.totalorder %s608_s17, %s608_s17 }
 0x17c   : > { %p2920_p11 = scmp.lt.s32.totalorder %s2918_s20, %s2911_s22 }
 0x17d   : > { %p2914_p7 = pnand %p2912_p5, %p3322_p8 }
 0x17e   : > { %p2921_p12 = por %p2920_p11, %p2919_p10 }
 0x17f   : > { %p2915_p9 = pneg %p2914_p7 }
 0x181   : > { %p2922_p4 = pnand %p2921_p12, %p2915_p9 }
 0x183   : > { %2925 = shalt.err (!%p2922_p4)
}
 0x184   : > { %2381 = dma.hbm_to_vmem [thread:$0]  (!%p3308_p6), %s3980_s12, 16, %s608_s17, [#allocation21]  }
 0x185   : > { %s2926_s23 = scalar_lea.hbm %s3982_s14, 16 }
 0x186   : > { %p2927_p1 = scmp.ne.s32.totalorder %s3982_s14, %s2926_s23  ;;  %p2933_p0 = scmp.lt.u32.totalorder %s2926_s23, %s3982_s14 }
 0x188   : > { %p2929_p3 = pnand %p2927_p1, %p3322_p8 }
 0x18a   : > { %p2930_p13 = pneg %p2929_p3 }
 0x18c   : > { %p2935_p2 = pnand %p2933_p0, %p2930_p13 }
 0x18e   : > { %2938 = shalt.err (!%p2935_p2)
}
 0x18f   : > { %s2939_s24 = scalar_lea.vmem %s632_s0, 16  ;;  %s2946_s17 = scalar_lea.vmem %s632_s0, 32 }
 0x190   : > { %p2940_p5 = scmp.ne.s32.totalorder %s632_s0, %s2939_s24  ;;  %p2947_p10 = scmp.lt.s32.totalorder %s632_s0, %s632_s0 }
 0x191   : > { %p2948_p11 = scmp.lt.s32.totalorder %s2946_s17, %s2939_s24 }
 0x192   : > { %p2942_p7 = pnand %p2940_p5, %p3322_p8 }
 0x193   : > { %p2949_p12 = por %p2948_p11, %p2947_p10 }
 0x194   : > { %p2943_p9 = pneg %p2942_p7 }
 0x196   : > { %p2950_p4 = pnand %p2949_p12, %p2943_p9 }
 0x198   : > { %2953 = shalt.err (!%p2950_p4)
}
 0x199   : > { %2387 = dma.hbm_to_vmem [thread:$0]  (!%p3308_p6), %s3982_s14, 16, %s632_s0, [#allocation24]  }
 0x19a   : > { %s3161_s18 = smov [#allocation28]   ;;  %s2954_s23 = scalar_lea.hbm %s3984_s16, 16 }
 0x19b   : > { %s655_s28 = sshll.u32 %s3161_s18, 4  ;;  %p2955_p1 = scmp.ne.s32.totalorder %s3984_s16, %s2954_s23  ;;  %s656_s28 = int_to_ptr.vmem [resolvable:$true] %s655_s28 }
 0x19c   : > { %p2961_p0 = scmp.lt.u32.totalorder %s2954_s23, %s3984_s16 }
 0x19d   : > { %p2957_p3 = pnand %p2955_p1, %p3322_p8 }
 0x19f   : > { %p2958_p13 = pneg %p2957_p3 }
 0x1a1   : > { %p2963_p2 = pnand %p2961_p0, %p2958_p13 }
 0x1a3   : > { %2966 = shalt.err (!%p2963_p2)
}
 0x1a4   : > { %s2967_s0 = scalar_lea.vmem %s656_s28, 16  ;;  %s2974_s24 = scalar_lea.vmem %s656_s28, 32 }
 0x1a5   : > { %p2968_p5 = scmp.ne.s32.totalorder %s656_s28, %s2967_s0  ;;  %p2975_p10 = scmp.lt.s32.totalorder %s656_s28, %s656_s28 }
 0x1a6   : > { %p2976_p11 = scmp.lt.s32.totalorder %s2974_s24, %s2967_s0 }
 0x1a7   : > { %p2970_p7 = pnand %p2968_p5, %p3322_p8 }
 0x1a8   : > { %p2977_p12 = por %p2976_p11, %p2975_p10 }
 0x1a9   : > { %p2971_p9 = pneg %p2970_p7 }
 0x1ab   : > { %p2978_p4 = pnand %p2977_p12, %p2971_p9 }
 0x1ad   : > { %2981 = shalt.err (!%p2978_p4)
}
 0x1ae   : > { %s4031_s20 = sld [smem:[#allocation45_spill]]  ;;  %s4032_s18 = sld [smem:[#allocation44_spill]] }
 0x1af   : > { %s4033_s21 = sld [smem:[#allocation43_spill]]  ;;  %s4034_s26 = sld [smem:[#allocation46_spill]] }
 0x1b0   : > { %2393 = dma.hbm_to_vmem [thread:$0]  (!%p3308_p6), %s3984_s16, 16, %s656_s28, [#allocation27]  }
 0x1b1   : > { %s2052_s25 = sadd.s32 4294967294, %s3142_s30   ;;  %s3644_s2 = sadd.s32 1, %s3142_s30  }
 0x1b2   : > { %s50_s23 = ssub.s32 %s3142_s30, %s3644_s2  ;;  %p61_p3 = scmp.eq.s32.totalorder %s3142_s30, 0 }
 0x1b3   : > { %p51_p8 = scmp.eq.s32.totalorder %s50_s23, 0  ;;  %p432_p7 = scmp.eq.s32.totalorder %s2052_s25, 1 }
 0x1b4   : > { %s53_s29 = sadd.s32 1, %s4031_s20  ;;  %p60_p1 = scmp.ne.s32.totalorder %s4031_s20, %s4032_s18 }
 0x1b5   : > { %p66_p13 = scmp.ne.s32.totalorder %s4032_s18, %s4033_s21  ;;  %p4036_p2 = scmp.eq.s32.totalorder %s4034_s26, 0 }
 0x1b6   : > { %s3655_s1 = scalar_select %p51_p8, %s4031_s20, %s53_s29  }
 0x1b7   : > { %p3657_p0 = por %p61_p3, %p60_p1  ;;  %p3663_p6 = por %p4036_p2, %p66_p13 }
 0x1b8   : > { %p426_p5 = scmp.eq.s32.totalorder %s4034_s26, 1  ;;  %p2421_p9 = scmp.lt.s32.totalorder %s3142_s30, 2 }
 0x1b9   : > { %s666_s3 = sand.u32 1, %s4031_s20   ;;  %p3674_p11 = por %p432_p7, %p66_p13 }
 0x1ba   : > { %p3670_p10 = por %p426_p5, %p60_p1  ;;  %s2071_s17 = sshll.u32 %s666_s3, 3 }
 0x1bb   : > { %s4039_s24 = scalar_select %p3674_p11, 1, 0 }
 0x1bc   : > { %s4038_s0 = scalar_select %p3670_p10, 1, 0 }
 0x1bd   : > { %s2072_s22 = sshll.u32 %s3142_s30, 7  ;;  %s4040_s23 = sld [smem:[#allocation48_spill]] }
 0x1be   : > { %s670_s20 = scalar_lea.vmem [#allocation2], %s2071_s17  ;;  %p3688_p12 = pnand %p2421_p9, %p3657_p0 }
 0x1bf   : > { %s677_s26 = sshll.u32 %s670_s20, 4  ;;  %s667_s4 = scalar_lea.sflag [#allocation3], %s666_s3  ;;  %s3684_s26 = int_to_ptr.vmem [resolvable:$true] %s677_s26 }
 0x1c0   : > { %p2984_p8 = pneg %p3688_p12 }
 0x1c3   : > { %s3682_s29 = scalar_lea.hbm %s4040_s23, %s2072_s22  ;;  %s2987_s18 = scalar_lea.hbm %s4040_s23, 256 }
 0x1c4   : > { %s2982_s5 = scalar_lea.hbm %s3682_s29, 128  ;;  %p2988_p13 = scmp.lt.u32.totalorder %s3682_s29, %s4040_s23 }
 0x1c5   : > { %p2983_p4 = scmp.ne.s32.totalorder %s3682_s29, %s2982_s5  ;;  %p2989_p0 = scmp.lt.u32.totalorder %s2987_s18, %s2982_s5 }
 0x1c6   : > { %p2991_p5 = scmp.lt.u32.totalorder %s2982_s5, %s3682_s29 }
 0x1c7   : > { %p2985_p1 = pnand %p2984_p8, %p2983_p4  ;;  %p2990_p2 = por %p2989_p0, %p2988_p13 }
 0x1c9   : > { %p2986_p3 = pneg %p2985_p1  ;;  %p2992_p7 = por %p2991_p5, %p2990_p2 }
 0x1cb   : > { %p2993_p9 = pnand %p2992_p7, %p2986_p3 }
 0x1cd   : > { %2996 = shalt.err (!%p2993_p9)
}
 0x1ce   : > { %s2997_s3 = scalar_lea.vmem %s3684_s26, 128  ;;  %s3162_s20 = smov [#allocation2]  }
 0x1cf   : > { %p2998_p4 = scmp.ne.s32.totalorder %s3684_s26, %s2997_s3  ;;  %s3002_s17 = sshll.u32 %s3162_s20, 4  ;;  %s3003_s17 = int_to_ptr.vmem [resolvable:$false] %s3002_s17 }
 0x1d0   : > { %s3004_s22 = scalar_lea.vmem %s3003_s17, 256  ;;  %p3005_p10 = scmp.lt.s32.totalorder %s3684_s26, %s3003_s17 }
 0x1d1   : > { %p3000_p1 = pnand %p2998_p4, %p2984_p8  ;;  %p3006_p13 = scmp.lt.s32.totalorder %s3004_s22, %s2997_s3 }
 0x1d3   : > { %p3001_p11 = pneg %p3000_p1  ;;  %p3007_p0 = por %p3006_p13, %p3005_p10 }
 0x1d5   : > { %p3008_p2 = pnand %p3007_p0, %p3001_p11 }
 0x1d7   : > { %3011 = shalt.err (!%p3008_p2)
}
 0x1d8   : > { %2397 = dma.hbm_to_vmem [thread:$0]  (!%p3688_p12), %s3682_s29, 128, %s3684_s26, %s667_s4  }
 0x1d9   : > { %s4042_s5 = sld [smem:[#allocation47_spill]] }
 0x1df   : > { %p4043_p3 = scmp.ne.s32.totalorder %s4042_s5, 0 }
 0x1e0   : > { %s4044_s18 = sld [smem:[#allocation44_spill]] (!%p4043_p3) }
 0x1e1   : > { %686 = sbr.rel (%p4043_p3) target bundleno = 3090 (0xc12), region = 88 }
 0x1e6   : > { %s3720_s27 = sand.u32 (!%p4043_p3), 1, %s4044_s18  }
 0x1e7   : > { %s4002_s21 = sshll.u32 (!%p4043_p3), %s3720_s27, 3  ;;  %s689_s3 = scalar_lea.sflag (!%p4043_p3), [#allocation3], %s3720_s27 }
 0x1e8   : > { %s692_s20 = scalar_lea.vmem [#allocation2], %s4002_s21 }
 0x1e9   : > { %3085 = dma.done.wait (%p3663_p6), %s689_s3, 128  }
 0x1ea   : > { %3087 = vsyncadd (%p3663_p6), %s689_s3, 4294967168  ;;  %s4045_s4 = sld [smem:[#allocation46_spill]] }
 0x1f0   : > { %p4046_p10 = scmp.eq.s32.totalorder %s4045_s4, 0 }
 0x1f2   : > { %3089 = dma.done.wait (%p4046_p10), [#allocation6], 32   ;;  %p4047_p11 = pmov %p4046_p10 }
 0x1f3   : > { %p4048_p12 = pmov %p4046_p10 }
 0x1f4   : > { %3091 = vsyncadd (%p4047_p11), [#allocation6], 4294967264 }
 0x1f5   : > { %3093 = dma.done.wait (%p4048_p12), [#allocation9], 272   ;;  %p4049_p8 = pmov %p4046_p10 }
 0x1f7   : > { %3095 = vsyncadd (%p4049_p8), [#allocation9], 4294967024  ;;  %p4050_p5 = pmov %p4049_p8 }
 0x1f9   : > { %3097 = dma.done.wait (%p4050_p5), [#allocation12], 272   ;;  %p4051_p7 = pmov %p4050_p5 }
 0x1fa   : > { %p4052_p6 = pmov %p4050_p5 }
 0x1fb   : > { %3099 = vsyncadd (%p4051_p7), [#allocation12], 4294967024 }
 0x1fc   : > { %3101 = dma.done.wait (%p4052_p6), [#allocation15], 272   ;;  %p4053_p9 = pmov %p4050_p5 }
 0x1fd   : > { %p4054_p4 = pmov %p4050_p5 }
 0x1fe   : > { %3103 = vsyncadd (%p4053_p9), [#allocation15], 4294967024 }
 0x1ff   : > { %3105 = dma.done.wait (%p4054_p4), [#allocation18], 272   ;;  %p4055_p1 = pmov %p4054_p4 }
 0x201   : > { %3107 = vsyncadd (%p4055_p1), [#allocation18], 4294967024  ;;  %p4056_p13 = pmov %p4055_p1 }
 0x202   : > { %p4057_p0 = pmov %p4055_p1 }
 0x203   : > { %3109 = dma.done.wait (%p4056_p13), [#allocation21], 32  }
 0x204   : > { %3111 = vsyncadd (%p4057_p0), [#allocation21], 4294967264  ;;  %p4058_p2 = pmov %p4057_p0 }
 0x205   : > { %p4059_p3 = pmov %p4057_p0 }
 0x206   : > { %3113 = dma.done.wait (%p4058_p2), [#allocation24], 272  }
 0x207   : > { %3115 = vsyncadd (%p4059_p3), [#allocation24], 4294967024  ;;  %p4060_p10 = pmov %p4057_p0 }
 0x208   : > { %p4061_p11 = pmov %p4057_p0 }
 0x209   : > { %3117 = dma.done.wait (%p4060_p10), [#allocation27], 528  }
 0x20a   : > { %3119 = vsyncadd (%p4061_p11), [#allocation27], 4294966768  ;;  %vm820_vm0 = vcmask 261120   ;;  %v3762_v0 = vld [vmem:[%s692_s20] sm:$0xff]  ;;  %v2498_v7 = vld [vmem:[#allocation8] sm:$0xff]   ;;  %v3163_v9 = vmov 0.0  }
 0x20b   : > { %v821_v1 = vsel %vm820_vm0, %v3762_v0, 0.0  ;;  %v2499_v8 = vld [vmem:[#allocation11] sm:$0xff]   ;;  %2175 = vmatprep.subr.bf16.mxu0 %v3163_v9  ;;  %2183 = vmatprep.subr.bf16.mxu1 %v3163_v9  ;;  %v2500_v10 = vld [vmem:[#allocation8 + $0x8] sm:$0xff]   ;;  %v2501_v11 = vld [vmem:[#allocation11 + $0x8] sm:$0xff]   ;;  %vm3164_vm1 = vmmov 0   ;;  %vm1067_vm2 = vcmask 64512  }
 0x20c   : > { %822 = vadd.xlane.f32.xlu0 %v821_v1  ;;  %2176 = vmatpush3.bf16.msra.mxu0 %v2498_v7  ;;  %v2093_v16 = vld [vmem:[#allocation5] ss:$0 sm:$0xff]  ;;  %v2094_v18 = vld [vmem:[#allocation7] ss:$0 sm:$0xff]  ;;  %v2502_v21 = vld [vmem:[#allocation14] sm:$0xff]   ;;  %s3165_s28 = smov 120  }
 0x20d   : > { %2184 = vmatpush3.bf16.msra.mxu1 %v2499_v8  ;;  %2177 = vmatprep.subr.bf16.mxu0 %v3163_v9  ;;  %v2503_v23 = vld [vmem:[#allocation14 + $0x8] sm:$0xff]   ;;  %v2099_v25 = vld [vmem:[#allocation13] ss:$0 sm:$0xff]  ;;  %s3166_s29 = smov 112   ;;  %s3167_s26 = smov 104   ;;  %vm1307_vm3 = vcmask 1043456  }
 0x20e   : > { %2185 = vmatprep.subr.bf16.mxu1 %v3163_v9  ;;  %2179 = vmatprep.mubr.msk.bf16.mxu0 %vm3164_vm1, %v3163_v9  ;;  %v2095_v24 = vld [vmem:[#allocation10] ss:$0 sm:$0xff]  ;;  %v2103_v46 = vld [vmem:[#allocation16] ss:$0 sm:$0xff]  ;;  %s2092_s25 = sshll.u32 %s3720_s27, 5  ;;  %s4003_s22 = smov 8  }
 0x20f   : > { %2187 = vmatprep.mubr.msk.bf16.mxu1 %vm3164_vm1, %v3163_v9  ;;  %s3832_s17 = scalar_lea.vmem [#allocation30], %s2092_s25  ;;  %s3169_s5 = smov 16   ;;  %vm1502_vm4 = vcmask 130048   ;;  %vm1504_vm5 = vcmask 195584   ;;  %vm1717_vm6 = vcmask 523264  }
 0x210   : > { %2178 = vmatpush3.bf16.msra.mxu0 %v2500_v10  ;;  %s3170_s18 = smov 24   ;;  %s2138_s3 = sshll.u32 %s4045_s4, 9 }
 0x211   : > { %2186 = vmatpush3.bf16.msra.mxu1 %v2501_v11  ;;  %2191 = vmatprep.subr.bf16.mxu0 %v3163_v9  ;;  %s1795_s20 = sshll.u32 %s3832_s17, 4  ;;  %p4063_p8 = scmp.ne.s32.totalorder %s4038_s0, 0  ;;  %s3889_s20 = int_to_ptr.vmem [resolvable:$true] %s1795_s20 }
 0x212   : > { %2199 = vmatprep.subr.bf16.mxu1 %v3163_v9  ;;  %s3171_s21 = smov [#allocation30]  }
 0x299   : > { %v823_v2 = vpop.xlane.xlu0 %822 }
 0x29a   : > { %v825_v3 = vmul.f32 0.03125, %v823_v2 }
 0x29c   : > { %v826_v4 = vsub.f32 %v3762_v0, %v825_v3 }
 0x29e   : > { %v827_v5 = vmul.f32 %v826_v4, %v826_v4 }
 0x2a0   : > { %v828_v6 = vsel %vm820_vm0, %v827_v5, 0.0 }
 0x2a1   : > { %829 = vadd.xlane.f32.xlu0 %v828_v6 }
 0x32e   : > { %v830_v12 = vpop.xlane.xlu0 %829 }
 0x32f   : > { %v831_v13 = vmul.f32 0.03125, %v830_v12 }
 0x331   : > { %v832_v14 = vadd.f32 1e-08, %v831_v13 }
 0x333   : > { %2512 = vrsqrt.f32 %v832_v14 }
 0x33d   : > { %v2513_v15 = vpop.eup %2512 }
 0x33e   : > { %v834_v17 = vmul.f32 %v2513_v15, %v826_v4 }
 0x340   : > { %v841_v19 = vmul.f32 %v2093_v16, %v834_v17 }
 0x342   : > { %v848_v20 = vadd.f32 %v2094_v18, %v841_v19 }
 0x344   : > { %v849_v22 = vpack.c.bf16 %v848_v20, %v848_v20 }
 0x346   : > { %2180 = vmatmul.mubr.msk.bf16.vlgmr.msra.gmra.mrb[0].mxu0 %vm820_vm0, %v849_v22  ;;  %2188 = vmatmul.mubr.msk.bf16.vlgmr.msra.gmra.mrb[0].mxu1 %vm820_vm0, %v849_v22 }
 0x347   : > { %2192 = vmatpush3.bf16.msra.mxu0 %v2502_v21  ;;  %2195 = vmatprep.mubr.msk.bf16.mxu0 %vm3164_vm1, %v3163_v9 }
 0x348   : > { %2193 = vmatprep.subr.bf16.mxu0 %v3163_v9  ;;  %2201 = vmatprep.mubr.msk.bf16.mxu1 %vm3164_vm1, %v3163_v9 }
 0x34b   : > { %2194 = vmatpush3.bf16.msra.mxu0 %v2503_v23 }
 0x34c   : > { %2205 = vmatprep.subr.bf16.mxu0 %v3163_v9 }
 0x34e   : > { %2196 = vmatmul.mubr.msk.bf16.vlgmr.msra.gmra.mrb[4].mxu0 %vm820_vm0, %v849_v22 }
 0x34f   : > { %2207 = vmatprep.mubr.msk.bf16.mxu0 %vm3164_vm1, %v3163_v9 }
 0x419   : > { %v910_v26 = vpop.f32.mrb[0].mxu0  ;;  %v973_v27 = vpop.f32.mrb[0].mxu1 }
 0x41a   : > { %v911_v28 = vadd.f32 %v2095_v24, %v910_v26  ;;  %v974_v29 = vadd.f32 %v2099_v25, %v973_v27  ;;  %v2181_v30 = vpop.f32.mrb[1].mxu0  ;;  %v2189_v31 = vpop.f32.mrb[1].mxu1 }
 0x41b   : > { %v913_v32 = vpop.f32.mrb[2].mxu0  ;;  %v976_v33 = vpop.f32.mrb[2].mxu1 }
 0x41c   : > { %v1042_v34 = vmul.f32 0.35355338, %v911_v28  ;;  %v1044_v35 = vpack.c.bf16 %v974_v29, %v974_v29  ;;  %v2182_v36 = vpop.f32.mrb[3].mxu0  ;;  %v2190_v37 = vpop.f32.mrb[3].mxu1 }
 0x41e   : > { %v1043_v38 = vpack.c.bf16 %v1042_v34, %v1042_v34  ;;  %1054 = vrot.lane.b32.xlu1 %v1044_v35, %s3165_s28  ;;  %v1072_v39 = vsel %vm1067_vm2, %v1044_v35, 0 }
 0x41f   : > { %2200 = vmatpush3.bf16.xpose.msra.mxu1 %v1072_v39 }
 0x420   : > { %1047 = vrot.lane.b32.xlu0 %v1043_v38, %s3165_s28  ;;  %2211 = vmatprep.subr.bf16.mxu1 %v3163_v9 }
 0x421   : > { %v1036_v40 = vpop.f32.mrb[4].mxu0 }
 0x422   : > { %1056 = vrot.lane.b32.xlu1 %v1044_v35, %s3166_s29  ;;  %v2197_v41 = vpop.f32.mrb[5].mxu0  ;;  %v1037_v48 = vadd.f32 %v2103_v46, %v1036_v40 }
 0x423   : > { %v1039_v42 = vpop.f32.mrb[6].mxu0 }
 0x424   : > { %v2198_v43 = vpop.f32.mrb[7].mxu0  ;;  %v3804_v52 = vpack.c.bf16 %v1037_v48, %v1037_v48 }
 0x426   : > { %1058 = vrot.lane.b32.xlu1 %v1044_v35, %s3167_s26  ;;  %2202 = vmatmul.mubr.msk.bf16.vlgmr.msra.gmra.mrb[4].mxu1 %vm1067_vm2, %v1043_v38  ;;  %v1309_v55 = vsel %vm1307_vm3, %v3804_v52, 0 }
 0x427   : > { %2213 = vmatprep.mubr.msk.bf16.mxu1 %vm3164_vm1, %v3163_v9 }
 0x42a   : > { %1049 = vrot.lane.b32.xlu1 %v1043_v38, %s3166_s29 }
 0x42e   : > { %1051 = vrot.lane.b32.xlu1 %v1043_v38, %s3167_s26 }
 0x490   : > { %v1055_v44 = vpop.permute.xlu1 %1054 }
 0x491   : > { %v1118_v45 = vsel %vm1067_vm2, %v1055_v44, 0 }
 0x492   : > { %2206 = vmatpush3.bf16.xpose.msra.mxu0 %v1118_v45  ;;  %v1048_v50 = vpop.permute.xlu0 %1047 }
 0x493   : > { %2217 = vmatprep.subr.bf16.mxu0 %v3163_v9 }
 0x494   : > { %v1057_v47 = vpop.permute.xlu1 %1056 }
 0x495   : > { %v1164_v49 = vsel %vm1067_vm2, %v1057_v47, 0 }
 0x496   : > { %2212 = vmatpush3.bf16.xpose.msra.mxu1 %v1164_v49 }
 0x497   : > { %2223 = vmatprep.subr.bf16.mxu1 %v3163_v9 }
 0x498   : > { %v1059_v51 = vpop.permute.xlu1 %1058 }
 0x499   : > { %v1210_v53 = vsel %vm1067_vm2, %v1059_v51, 0  ;;  %2208 = vmatmul.mubr.msk.bf16.vlgmr.msra.gmra.mrb[8].mxu0 %vm1067_vm2, %v1048_v50 }
 0x49a   : > { %2218 = vmatpush3.bf16.xpose.msra.mxu0 %v1210_v53  ;;  %2219 = vmatprep.mubr.msk.bf16.mxu0 %vm3164_vm1, %v3163_v9 }
 0x49b   : > { %2229 = vmatprep.subr.bf16.mxu0 %v3163_v9 }
 0x49c   : > { %v1050_v54 = vpop.permute.xlu1 %1049 }
 0x49d   : > { %2214 = vmatmul.mubr.msk.bf16.vlgmr.msra.gmra.mrb[8].mxu1 %vm1067_vm2, %v1050_v54 }
 0x49e   : > { %2224 = vmatpush3.bf16.msra.mxu1 %v1309_v55  ;;  %2225 = vmatprep.mubr.msk.bf16.mxu1 %vm3164_vm1, %v3163_v9 }
 0x49f   : > { %2235 = vmatprep.subr.bf16.mxu1 %v3163_v9 }
 0x4a0   : > { %v1052_v56 = vpop.permute.xlu1 %1051 }
 0x4a1   : > { %2220 = vmatmul.mubr.msk.bf16.vlgmr.msra.gmra.mrb[12].mxu0 %vm1067_vm2, %v1052_v56 }
 0x4a2   : > { %2231 = vmatprep.mubr.msk.bf16.mxu0 %vm3164_vm1, %v3163_v9 }
 0x4f9   : > { %v1108_v57 = vpop.f32.mrb[4].mxu1 }
 0x4fa   : > { %v2203_v58 = vpop.f32.mrb[5].mxu1  ;;  %v1252_v59 = vsel %vm1067_vm2, %v1108_v57, -inf }
 0x4fb   : > { %1253 = vmax.xlane.f32.xlu1 %v1252_v59  ;;  %v1111_v60 = vpop.f32.mrb[6].mxu1 }
 0x4fc   : > { %v2204_v61 = vpop.f32.mrb[7].mxu1 }
 0x4fd   : > { %v2504_v61 = vld [vmem:[#allocation17] sm:$0xff]  }
 0x56c   : > { %v1154_v62 = vpop.f32.mrb[8].mxu0 }
 0x56d   : > { %v2209_v63 = vpop.f32.mrb[9].mxu0  ;;  %v1255_v1 = vsel %vm1067_vm2, %v1154_v62, -inf }
 0x56e   : > { %1256 = vmax.xlane.f32.xlu0 %v1255_v1  ;;  %v1157_v2 = vpop.f32.mrb[10].mxu0 }
 0x56f   : > { %v2210_v3 = vpop.f32.mrb[11].mxu0 }
 0x570   : > { %v1200_v4 = vpop.f32.mrb[8].mxu1 }
 0x571   : > { %v2215_v5 = vpop.f32.mrb[9].mxu1  ;;  %v1258_v6 = vsel %vm1067_vm2, %v1200_v4, -inf }
 0x572   : > { %1259 = vmax.xlane.f32.xlu1 %v1258_v6  ;;  %v1203_v7 = vpop.f32.mrb[10].mxu1 }
 0x573   : > { %v2216_v8 = vpop.f32.mrb[11].mxu1  ;;  %v2505_v7 = vld [vmem:[#allocation17 + $0x8] sm:$0xff]  }
 0x574   : > { %v1246_v10 = vpop.f32.mrb[12].mxu0 }
 0x575   : > { %v2221_v11 = vpop.f32.mrb[13].mxu0  ;;  %v1261_v12 = vsel %vm1067_vm2, %v1246_v10, -inf }
 0x576   : > { %1262 = vmax.xlane.f32.xlu1 %v1261_v12  ;;  %v1249_v13 = vpop.f32.mrb[14].mxu0 }
 0x577   : > { %v2222_v14 = vpop.f32.mrb[15].mxu0 }
 0x588   : > { %v1254_v15 = vpop.xlane.xlu1 %1253 }
 0x589   : > { %v1264_v16 = vsub.f32 %v1108_v57, %v1254_v15 }
 0x58b   : > { %v1268_v17 = vmul.f32 1.442695, %v1264_v16 }
 0x58d   : > { %2514 = vpow2.f32 %v1268_v17 }
 0x597   : > { %v2515_v18 = vpop.eup %2514 }
 0x598   : > { %v1276_v19 = vsel %vm1067_vm2, %v2515_v18, 0.0 }
 0x599   : > { %1277 = vadd.xlane.f32.xlu0 %v1276_v19 }
 0x5fb   : > { %v1257_v20 = vpop.xlane.xlu0 %1256 }
 0x5fc   : > { %v1265_v21 = vsub.f32 %v1154_v62, %v1257_v20  ;;  %v2115_v20 = vld [vmem:[#allocation19] ss:$0 sm:$0xff] }
 0x5fe   : > { %v1270_v22 = vmul.f32 1.442695, %v1265_v21 }
 0x5ff   : > { %v1260_v23 = vpop.xlane.xlu1 %1259 }
 0x600   : > { %2516 = vpow2.f32 %v1270_v22  ;;  %v1266_v24 = vsub.f32 %v1200_v4, %v1260_v23 }
 0x602   : > { %v1272_v25 = vmul.f32 1.442695, %v1266_v24 }
 0x603   : > { %v1263_v31 = vpop.xlane.xlu1 %1262 }
 0x604   : > { %2518 = vpow2.f32 %v1272_v25  ;;  %v1267_v32 = vsub.f32 %v1246_v10, %v1263_v31 }
 0x606   : > { %v1274_v33 = vmul.f32 1.442695, %v1267_v32 }
 0x60a   : > { %v2517_v26 = vpop.eup %2516 }
 0x60b   : > { %v1279_v27 = vsel %vm1067_vm2, %v2517_v26, 0.0 }
 0x60c   : > { %1280 = vadd.xlane.f32.xlu1 %v1279_v27 }
 0x60e   : > { %v2519_v28 = vpop.eup %2518 }
 0x60f   : > { %v1282_v29 = vsel %vm1067_vm2, %v2519_v28, 0.0 }
 0x610   : > { %1283 = vadd.xlane.f32.xlu0 %v1282_v29 }
 0x61d   : > { %1063 = vrot.lane.b32.xlu1 %v3804_v52, %s3166_s29 }
 0x626   : > { %1061 = vrot.lane.b32.xlu0 %v3804_v52, %s3165_s28  ;;  %v1278_v30 = vpop.xlane.xlu0 %1277 }
 0x627   : > { %2520 = vrcp.f32 %v1278_v30 }
 0x628   : > { %2522 = vpow2.f32 %v1274_v33  ;;  %v2506_v33 = vld [vmem:[#allocation23] sm:$0xff]  }
 0x631   : > { %v2521_v34 = vpop.eup %2520 }
 0x632   : > { %v1289_v35 = vmul.f32 %v2521_v34, %v2515_v18  ;;  %v2523_v37 = vpop.eup %2522  ;;  %v2507_v34 = vld [vmem:[#allocation23 + $0x8] sm:$0xff]  }
 0x633   : > { %v1285_v38 = vsel %vm1067_vm2, %v2523_v37, 0.0 }
 0x634   : > { %1296 = vst.msk [vmem:[%s3832_s17] sm:$0xff] %vm1067_vm2, %v1289_v35  ;;  %v1300_v36 = vpack.c.bf16 %v1289_v35, %v1289_v35 }
 0x636   : > { %2226 = vmatmul.mubr.msk.bf16.vlgmr.msra.gmra.mrb[12].mxu1 %vm1067_vm2, %v1300_v36 }
 0x637   : > { %2237 = vmatprep.mubr.msk.bf16.mxu1 %vm3164_vm1, %v3163_v9 }
 0x641   : > { %1286 = vadd.xlane.f32.xlu1 %v1285_v38  ;;  %v2119_v38 = vld [vmem:[#allocation20] ss:$0 sm:$0xff] }
 0x652   : > { %1065 = vrot.lane.b32.xlu1 %v3804_v52, %s3167_s26  ;;  %s4062_s26 = sld [smem:[#allocation58_spill]] }
 0x658   : > { %s3887_s25 = scalar_lea.hbm %s4062_s26, %s2138_s3 }
 0x699   : > { %v1281_v39 = vpop.xlane.xlu1 %1280 }
 0x69a   : > { %2524 = vrcp.f32 %v1281_v39 }
 0x69d   : > { %v1284_v40 = vpop.xlane.xlu0 %1283  ;;  %v1064_v41 = vpop.permute.xlu1 %1063 }
 0x69e   : > { %2526 = vrcp.f32 %v1284_v40  ;;  %v1401_v42 = vsel %vm1307_vm3, %v1064_v41, 0  ;;  %v2120_v40 = vld [vmem:[#allocation22] ss:$0 sm:$0xff] }
 0x69f   : > { %2236 = vmatpush3.bf16.msra.mxu1 %v1401_v42 }
 0x6a0   : > { %2247 = vmatprep.subr.bf16.mxu1 %v3163_v9 }
 0x6a1   : > { %v1062_v43 = vpop.permute.xlu0 %1061 }
 0x6a2   : > { %v1355_v44 = vsel %vm1307_vm3, %v1062_v43, 0 }
 0x6a3   : > { %2230 = vmatpush3.bf16.msra.mxu0 %v1355_v44  ;;  %v2508_v44 = vld [vmem:[#allocation26] sm:$0xff]  }
 0x6a4   : > { %v2525_v45 = vpop.eup %2524  ;;  %2241 = vmatprep.subr.bf16.mxu0 %v3163_v9 }
 0x6a5   : > { %v1291_v46 = vmul.f32 %v2525_v45, %v2517_v26  ;;  %v2509_v45 = vld [vmem:[#allocation26 + $0x8] sm:$0xff]  }
 0x6a7   : > { %1297 = vst.msk [vmem:[%s3832_s17 + $0x8] sm:$0xff] %vm1067_vm2, %v1291_v46  ;;  %v1301_v47 = vpack.c.bf16 %v1291_v46, %v1291_v46  ;;  %v2510_v46 = vld [vmem:[#allocation26 + $0x10] sm:$0xff]  }
 0x6a8   : > { %v2527_v48 = vpop.eup %2526 }
 0x6a9   : > { %v1293_v49 = vmul.f32 %v2527_v48, %v2519_v28  ;;  %2232 = vmatmul.mubr.msk.bf16.vlgmr.msra.gmra.mrb[16].mxu0 %vm1067_vm2, %v1301_v47  ;;  %v2511_v47 = vld [vmem:[#allocation26 + $0x18] sm:$0xff]  }
 0x6aa   : > { %2243 = vmatprep.mubr.msk.bf16.mxu0 %vm3164_vm1, %v3163_v9  ;;  %v2121_v48 = vld [vmem:[#allocation25] ss:$0 sm:$0xff] }
 0x6ab   : > { %1298 = vst.msk [vmem:[%s3832_s17 + $0x10] sm:$0xff] %vm1067_vm2, %v1293_v49  ;;  %v1302_v50 = vpack.c.bf16 %v1293_v49, %v1293_v49 }
 0x6ad   : > { %2238 = vmatmul.mubr.msk.bf16.vlgmr.msra.gmra.mrb[16].mxu1 %vm1067_vm2, %v1302_v50 }
 0x6ae   : > { %2251 = vmatprep.mubr.msk.bf16.mxu1 %vm3164_vm1, %v3163_v9  ;;  %2248 = vmatpush3.bf16.msra.mxu1 %v2504_v61 }
 0x6af   : > { %2249 = vmatprep.subr.bf16.mxu1 %v3163_v9 }
 0x6b2   : > { %2250 = vmatpush3.bf16.msra.mxu1 %v2505_v7 }
 0x6b3   : > { %2263 = vmatprep.subr.bf16.mxu1 %v3163_v9 }
 0x6ce   : > { %v1287_v51 = vpop.xlane.xlu1 %1286 }
 0x6cf   : > { %2528 = vrcp.f32 %v1287_v51 }
 0x6d2   : > { %v1066_v52 = vpop.permute.xlu1 %1065 }
 0x6d3   : > { %v1447_v53 = vsel %vm1307_vm3, %v1066_v52, 0 }
 0x6d4   : > { %2242 = vmatpush3.bf16.msra.mxu0 %v1447_v53 }
 0x6d5   : > { %2255 = vmatprep.subr.bf16.mxu0 %v3163_v9 }
 0x6d9   : > { %v2529_v54 = vpop.eup %2528 }
 0x6da   : > { %v1295_v55 = vmul.f32 %v2529_v54, %v2523_v37 }
 0x6dc   : > { %1299 = vst.msk [vmem:[%s3832_s17 + $0x18] sm:$0xff] %vm1067_vm2, %v1295_v55  ;;  %v1303_v56 = vpack.c.bf16 %v1295_v55, %v1295_v55 }
 0x6de   : > { %2244 = vmatmul.mubr.msk.bf16.vlgmr.msra.gmra.mrb[20].mxu0 %vm1067_vm2, %v1303_v56 }
 0x6df   : > { %2259 = vmatprep.mubr.msk.bf16.mxu0 %vm3164_vm1, %v3163_v9  ;;  %2256 = vmatpush3.bf16.msra.mxu0 %v2506_v33 }
 0x6e0   : > { %2257 = vmatprep.subr.bf16.mxu0 %v3163_v9 }
 0x6e3   : > { %2258 = vmatpush3.bf16.msra.mxu0 %v2507_v34 }
 0x709   : > { %v1345_v57 = vpop.f32.mrb[12].mxu1 }
 0x70a   : > { %v2227_v58 = vpop.f32.mrb[13].mxu1 }
 0x70b   : > { %v1348_v59 = vpop.f32.mrb[14].mxu1 }
 0x70c   : > { %v2228_v60 = vpop.f32.mrb[15].mxu1 }
 0x77c   : > { %v1391_v62 = vpop.f32.mrb[16].mxu0 }
 0x77d   : > { %1490 = vrot.lane.b32.xlu0 %v1391_v62, %s4003_s22  ;;  %v2233_v63 = vpop.f32.mrb[17].mxu0  ;;  %s3016_s22 = sshll.u32 %s3171_s21, 4  ;;  %s3017_s22 = int_to_ptr.vmem [resolvable:$false] %s3016_s22 }
 0x77e   : > { %v1394_v1 = vpop.f32.mrb[18].mxu0  ;;  %s3018_s17 = scalar_lea.vmem %s3017_s22, 1024  ;;  %p3019_p6 = scmp.lt.s32.totalorder %s3889_s20, %s3017_s22 }
 0x77f   : > { %v2234_v2 = vpop.f32.mrb[19].mxu0 }
 0x780   : > { %v1437_v3 = vpop.f32.mrb[16].mxu1 }
 0x781   : > { %1494 = vrot.lane.b32.xlu1 %v1437_v3, %s3169_s5  ;;  %v2239_v4 = vpop.f32.mrb[17].mxu1 }
 0x782   : > { %v1440_v5 = vpop.f32.mrb[18].mxu1 }
 0x783   : > { %v2240_v6 = vpop.f32.mrb[19].mxu1 }
 0x7b1   : > { %v1483_v8 = vpop.f32.mrb[20].mxu0 }
 0x7b2   : > { %1498 = vrot.lane.b32.xlu0 %v1483_v8, %s3170_s18  ;;  %v2245_v10 = vpop.f32.mrb[21].mxu0  ;;  %s3012_s18 = scalar_lea.vmem %s3889_s20, 512 }
 0x7b3   : > { %v1486_v11 = vpop.f32.mrb[22].mxu0  ;;  %p3013_p12 = scmp.ne.s32.totalorder %s3889_s20, %s3012_s18  ;;  %p3020_p9 = scmp.lt.s32.totalorder %s3018_s17, %s3012_s18 }
 0x7b4   : > { %v2246_v12 = vpop.f32.mrb[23].mxu0 }
 0x7b5   : > { %p3014_p5 = pnand %p3013_p12, %p4063_p8  ;;  %p3021_p4 = por %p3020_p9, %p3019_p6 }
 0x7b7   : > { %p3015_p7 = pneg %p3014_p5 }
 0x7b9   : > { %p3022_p1 = pnand %p3021_p4, %p3015_p7 }
 0x7ef   : > { %v1491_v13 = vpop.permute.xlu0 %1490 }
 0x7f0   : > { %v1501_v15 = vsel %vm1067_vm2, %v1345_v57, %v1491_v13 }
 0x7f3   : > { %v1495_v14 = vpop.permute.xlu1 %1494 }
 0x7f4   : > { %v1503_v16 = vsel %vm1502_vm4, %v1501_v15, %v1495_v14 }
 0x824   : > { %v1499_v17 = vpop.permute.xlu0 %1498 }
 0x825   : > { %v1505_v18 = vsel %vm1504_vm5, %v1503_v16, %v1499_v17 }
 0x826   : > { %v1506_v19 = vpack.c.bf16 %v1505_v18, %v1505_v18 }
 0x828   : > { %2252 = vmatmul.mubr.msk.bf16.vlgmr.msra.gmra.mrb[20].mxu1 %vm820_vm0, %v1506_v19 }
 0x829   : > { %2271 = vmatprep.mubr.msk.bf16.mxu1 %vm3164_vm1, %v3163_v9  ;;  %2264 = vmatpush3.bf16.msra.mxu1 %v2508_v44 }
 0x82a   : > { %2265 = vmatprep.subr.bf16.mxu1 %v3163_v9 }
 0x82d   : > { %2266 = vmatpush3.bf16.msra.mxu1 %v2509_v45 }
 0x82e   : > { %2267 = vmatprep.subr.bf16.mxu1 %v3163_v9 }
 0x831   : > { %2268 = vmatpush3.bf16.msra.mxu1 %v2510_v46 }
 0x832   : > { %2269 = vmatprep.subr.bf16.mxu1 %v3163_v9 }
 0x835   : > { %2270 = vmatpush3.bf16.msra.mxu1 %v2511_v47 }
 0x8fb   : > { %v1567_v21 = vpop.f32.mrb[20].mxu1 }
 0x8fc   : > { %v1568_v22 = vadd.f32 %v2115_v20, %v1567_v21  ;;  %v2253_v23 = vpop.f32.mrb[21].mxu1 }
 0x8fd   : > { %v1570_v24 = vpop.f32.mrb[22].mxu1 }
 0x8fe   : > { %v3871_v25 = vadd.f32 %v1568_v22, %v3762_v0  ;;  %v2254_v26 = vpop.f32.mrb[23].mxu1 }
 0x900   : > { %v1574_v27 = vsel %vm820_vm0, %v3871_v25, 0.0 }
 0x901   : > { %1575 = vadd.xlane.f32.xlu1 %v1574_v27 }
 0x98e   : > { %v1576_v28 = vpop.xlane.xlu1 %1575 }
 0x98f   : > { %v1577_v29 = vmul.f32 0.03125, %v1576_v28 }
 0x991   : > { %v1578_v30 = vsub.f32 %v3871_v25, %v1577_v29 }
 0x993   : > { %v1579_v31 = vmul.f32 %v1578_v30, %v1578_v30 }
 0x995   : > { %v1580_v32 = vsel %vm820_vm0, %v1579_v31, 0.0 }
 0x996   : > { %1581 = vadd.xlane.f32.xlu0 %v1580_v32 }
 0xa23   : > { %v1582_v0 = vpop.xlane.xlu0 %1581 }
 0xa24   : > { %v1583_v35 = vmul.f32 0.03125, %v1582_v0 }
 0xa26   : > { %v1584_v36 = vadd.f32 1e-08, %v1583_v35 }
 0xa28   : > { %2530 = vrsqrt.f32 %v1584_v36 }
 0xa32   : > { %v2531_v37 = vpop.eup %2530 }
 0xa33   : > { %v1586_v39 = vmul.f32 %v2531_v37, %v1578_v30 }
 0xa35   : > { %v1593_v41 = vmul.f32 %v2119_v38, %v1586_v39 }
 0xa37   : > { %v1600_v42 = vadd.f32 %v2120_v40, %v1593_v41 }
 0xa39   : > { %v1601_v43 = vpack.c.bf16 %v1600_v42, %v1600_v42 }
 0xa3b   : > { %2260 = vmatmul.mubr.msk.bf16.vlgmr.msra.gmra.mrb[24].mxu0 %vm820_vm0, %v1601_v43 }
 0xb0e   : > { %v1662_v49 = vpop.f32.mrb[24].mxu0 }
 0xb0f   : > { %v1663_v50 = vadd.f32 %v2121_v48, %v1662_v49  ;;  %v2261_v51 = vpop.f32.mrb[25].mxu0 }
 0xb10   : > { %v1665_v52 = vpop.f32.mrb[26].mxu0 }
 0xb11   : > { %v1669_v53 = vmul.f32 0.044715, %v1663_v50  ;;  %v2262_v54 = vpop.f32.mrb[27].mxu0  ;;  %v1668_v60 = vmul.f32 0.5, %v1663_v50 }
 0xb13   : > { %v1670_v55 = vmul.f32 %v1669_v53, %v1663_v50 }
 0xb15   : > { %v1671_v56 = vmul.f32 %v1670_v55, %v1663_v50 }
 0xb17   : > { %v1672_v57 = vadd.f32 %v1671_v56, %v1663_v50 }
 0xb19   : > { %v1673_v58 = vmul.f32 0.7978846, %v1672_v57 }
 0xb1b   : > { %2532 = vtanh.f32 %v1673_v58 }
 0xb25   : > { %v2533_v59 = vpop.eup %2532 }
 0xb26   : > { %v1675_v9 = vadd.f32 1.0, %v2533_v59 }
 0xb28   : > { %v1676_v61 = vmul.f32 %v1675_v9, %v1668_v60 }
 0xb2a   : > { %v1677_v62 = vpack.c.bf16 %v1676_v61, %v1676_v61 }
 0xb2c   : > { %2272 = vmatmul.mubr.msk.bf16.vlgmr.msra.gmra.mrb[24].mxu1 %vm1717_vm6, %v1677_v62 }
 0xb2d   : > { %3025 = shalt.err (!%p3022_p1)
}
 0xb2e   : > { %s3026_s3 = scalar_lea.hbm %s3887_s25, 512  ;;  %s3030_s21 = scalar_lea.hbm %s4062_s26, 1024 }
 0xb2f   : > { %p3027_p13 = scmp.ne.s32.totalorder %s3887_s25, %s3026_s3  ;;  %p3031_p3 = scmp.lt.u32.totalorder %s3887_s25, %s4062_s26 }
 0xb30   : > { %p3032_p10 = scmp.lt.u32.totalorder %s3030_s21, %s3026_s3  ;;  %p3034_p12 = scmp.lt.u32.totalorder %s3026_s3, %s3887_s25 }
 0xb31   : > { %p3028_p0 = pnand %p3027_p13, %p4063_p8 }
 0xb32   : > { %p3033_p11 = por %p3032_p10, %p3031_p3 }
 0xb33   : > { %p3029_p2 = pneg %p3028_p0 }
 0xb34   : > { %p3035_p5 = por %p3034_p12, %p3033_p11 }
 0xb36   : > { %p3036_p7 = pnand %p3035_p5, %p3029_p2 }
 0xb38   : > { %3039 = shalt.err (!%p3036_p7)
}
 0xb39   : > { %s3172_s18 = smov 128   ;;  %s4064_s17 = smov 8   ;;  %v2125_v63 = vld [vmem:[#allocation28] ss:$0 sm:$0xff] }
 0xb3a   : > { %s4065_s6 = scalar_lea.sflag [#allocation31], %s3720_s27  ;;  %s2133_s5 = sshll.u32 %s4045_s4, 7 }
 0xb3b   : > { %2342 = dma.vmem_to_hbm [thread:$0]  (%p4063_p8), %s3889_s20, 512, %s3887_s25, %s4065_s6, %s3172_s18, %s3172_s18, %s4064_s17  }
 0xb3c   : > { %s4066_s3 = sshll.u32 %s3720_s27, 3  ;;  %s4067_s7 = sld [smem:[#allocation57_spill]] }
 0xb3d   : > { %s806_s28 = scalar_lea.vmem [#allocation29], %s4066_s3  ;;  %s1764_s6 = scalar_lea.sflag [#allocation4], %s3720_s27 }
 0xb3e   : > { %s1782_s29 = sshll.u32 %s806_s28, 4  ;;  %s3173_s20 = smov [#allocation29]   ;;  %s3925_s29 = int_to_ptr.vmem [resolvable:$true] %s1782_s29 }
 0xb3f   : > { %s3040_s4 = scalar_lea.vmem %s3925_s29, 128  ;;  %s3044_s25 = sshll.u32 %s3173_s20, 4  ;;  %s3045_s25 = int_to_ptr.vmem [resolvable:$false] %s3044_s25 }
 0xb40   : > { %p3041_p6 = scmp.ne.s32.totalorder %s3925_s29, %s3040_s4  ;;  %s3046_s18 = scalar_lea.vmem %s3045_s25, 256 }
 0xb41   : > { %p3047_p1 = scmp.lt.s32.totalorder %s3925_s29, %s3045_s25  ;;  %p3048_p13 = scmp.lt.s32.totalorder %s3046_s18, %s3040_s4 }
 0xb42   : > { %s3923_s8 = scalar_lea.hbm %s4067_s7, %s2133_s5  ;;  %p3042_p9 = pnand %p3041_p6, %p4063_p8 }
 0xb43   : > { %p3049_p0 = por %p3048_p13, %p3047_p1 }
 0xb44   : > { %p3043_p4 = pneg %p3042_p9 }
 0xb46   : > { %p3050_p2 = pnand %p3049_p0, %p3043_p4 }
 0xbff   : > { %v1755_v1 = vpop.f32.mrb[24].mxu1 }
 0xc00   : > { %v1756_v2 = vadd.f32 %v2125_v63, %v1755_v1  ;;  %v2273_v3 = vpop.f32.mrb[25].mxu1 }
 0xc01   : > { %v1758_v4 = vpop.f32.mrb[26].mxu1 }
 0xc02   : > { %v1761_v5 = vadd.f32 %v1756_v2, %v3871_v25  ;;  %v2274_v6 = vpop.f32.mrb[27].mxu1 }
 0xc04   : > { %1762 = vst.msk [vmem:[%s806_s28] sm:$0xff] %vm820_vm0, %v1761_v5 }
 0xc05   : > { %3053 = shalt.err (!%p3050_p2)
}
 0xc06   : > { %s3054_s27 = scalar_lea.hbm %s3923_s8, 128  ;;  %s3058_s3 = scalar_lea.hbm %s4067_s7, 256 }
 0xc07   : > { %p3055_p3 = scmp.ne.s32.totalorder %s3923_s8, %s3054_s27  ;;  %p3059_p12 = scmp.lt.u32.totalorder %s3923_s8, %s4067_s7 }
 0xc08   : > { %p3060_p5 = scmp.lt.u32.totalorder %s3058_s3, %s3054_s27  ;;  %p3062_p6 = scmp.lt.u32.totalorder %s3054_s27, %s3923_s8 }
 0xc09   : > { %p3056_p10 = pnand %p3055_p3, %p4063_p8 }
 0xc0a   : > { %p3061_p7 = por %p3060_p5, %p3059_p12 }
 0xc0b   : > { %p3057_p11 = pneg %p3056_p10 }
 0xc0c   : > { %p3063_p9 = por %p3062_p6, %p3061_p7 }
 0xc0e   : > { %p3064_p4 = pnand %p3063_p9, %p3057_p11 }
 0xc10   : > { %3067 = shalt.err (!%p3064_p4)
}
 0xc11   : > { %2341 = dma.vmem_to_hbm [thread:$0]  (%p4063_p8), %s3925_s29, 128, %s3923_s8, %s1764_s6  }
 0xc12 PF: > { %s4068_s22 = sld [smem:[#allocation43_spill]]  ;;  %p4069_p1 = scmp.ne.s32.totalorder %s4039_s24, 0 }
 0xc13   : > { %p4070_p13 = scmp.ge.s32.totalorder %s3142_s30, 2 }
 0xc15   : > { %p2399_p0 = pnand %p4070_p13, %p4069_p1 }
 0xc18   : > { %s1810_s4 = sand.u32 1, %s4068_s22  }
 0xc19   : > { %s1811_s20 = scalar_lea.sflag [#allocation4], %s1810_s4 }
 0xc1a   : > { %3121 = dma.done.wait (!%p2399_p0), %s1811_s20, 128  }
 0xc1b   : > { %3123 = vsyncadd (!%p2399_p0), %s1811_s20, 4294967168  ;;  %s1820_s25 = scalar_lea.sflag [#allocation31], %s1810_s4 }
 0xc1c   : > { %3125 = dma.done.wait (!%p2399_p0), %s1820_s25, 512  }
 0xc1d   : > { %3127 = vsyncadd (!%p2399_p0), %s1820_s25, 4294966784  ;;  %s4071_s27 = sld [smem:[#allocation44_spill]]  ;;  %s4072_s28 = sld [smem:[#allocation45_spill]] }
 0xc1e   : > { %p43_p8 = scmp.ge.s32.totalorder %s3644_s2, 4   ;;  %s4073_s29 = smov %s3655_s1 }
 0xc1f   : > { %s4074_s30 = smov %s3644_s2 }
 0xc20   :  { %45 = sbr.rel (!%p43_p8) target bundleno = 27 (0x1b), region = 214 }
 0xc27   :  { %1825 = vsyncpa [#allocation3], 1 }
 0xc28   :  { %1827 = vsyncpa [#allocation3 + $0x1], 1 }
 0xc29   :  { %1828 = vsyncpa [#allocation6], 1 }
 0xc2a   :  { %1829 = vsyncpa [#allocation9], 1 }
 0xc2b   :  { %1830 = vsyncpa [#allocation12], 1 }
 0xc2c   :  { %1831 = vsyncpa [#allocation15], 1 }
 0xc2d   :  { %1832 = vsyncpa [#allocation18], 1 }
 0xc2e   :  { %1833 = vsyncpa [#allocation21], 1 }
 0xc2f   :  { %1834 = vsyncpa [#allocation24], 1 }
 0xc30   :  { %1835 = vsyncpa [#allocation27], 1 }
 0xc31   :  { %1836 = vsyncpa [#allocation4], 1 }
 0xc32   :  { %1838 = vsyncpa [#allocation4 + $0x1], 1 }
 0xc33   :  { %1839 = vsyncpa [#allocation31], 1 }
 0xc34   :  { %1841 = vsyncpa [#allocation31 + $0x1], 1 }

</bundles_post_ra>
